<compile_context>
chip_gen: v7x
topology: tpu7x:2x2x1
jax: 0.10.0
libtpu: 0.0.40
codegen_flags: <defaults>
</compile_context>

<pallas_src>
import jax
import jax.numpy as jnp
from jax import lax
from jax.experimental import pallas as pl
from jax.experimental.pallas import tpu as pltpu


# ------------------------------- kernel -------------------------------

def _conv3x3_fused(x2d, w_fused, H, WC_out):
    """3x3 conv (stride 1, pad 1) on lane-folded rows with batch folded into M.

    x2d:     (B_blk*H, W*Cin)   bf16.
    w_fused: (W*Cin, 3*W*Cout)  banded (block-Toeplitz over width) weights,
             the three kh taps concatenated along the output/lane dim.
    Returns  (B_blk*H, W*Cout)  f32.
    """
    BH = x2d.shape[0]
    p = jnp.dot(x2d, w_fused, preferred_element_type=jnp.float32)   # (BH, 3*WC_out)
    p0 = p[:, 0 * WC_out:1 * WC_out]      # kh = 0
    p1 = p[:, 1 * WC_out:2 * WC_out]      # kh = 1
    p2 = p[:, 2 * WC_out:3 * WC_out]      # kh = 2
    # out[r] = p0[r-1] + p1[r] + p2[r+1]; rows outside each image are zero pad.
    # Sublane shifts via pltpu.roll (XLU); rows wrapping an image boundary are
    # exactly the rows that must be zero, so one iota mask handles both.
    row = lax.broadcasted_iota(jnp.int32, (BH, 1), 0)
    down = jnp.where((row % H) != 0,     pltpu.roll(p0, shift=1,      axis=0), 0.0)
    up   = jnp.where((row % H) != H - 1, pltpu.roll(p2, shift=BH - 1, axis=0), 0.0)
    return down + p1 + up


def _make_block_kernel(has_downsample, H, WC_out):
    def kernel(x_ref, w1_ref, s1_ref, b1_ref, w2_ref, s2_ref, b2_ref, *rest):
        if has_downsample:
            wd_ref, sd_ref, bd_ref, out_ref = rest
        else:
            (out_ref,) = rest

        b_blk = x_ref.shape[0]
        bh = b_blk * H
        x2d = x_ref[...].reshape(bh, x_ref.shape[2])       # (B_blk*H, W*Cin) bf16

        # conv1 -> bn1 -> relu    (f32 accumulation + f32 epilogue)
        y1 = jnp.maximum(
            _conv3x3_fused(x2d, w1_ref[...], H, WC_out) * s1_ref[...] + b1_ref[...],
            0.0)

        # conv2 -> bn2            (bf16 MXU operands, f32 accumulation)
        out2 = (_conv3x3_fused(y1.astype(jnp.bfloat16), w2_ref[...], H, WC_out)
                * s2_ref[...] + b2_ref[...])

        # residual path
        if has_downsample:
            res = jnp.dot(x2d, wd_ref[...], preferred_element_type=jnp.float32)
            res = res * sd_ref[...] + bd_ref[...]
        else:
            res = x2d.astype(jnp.float32)                  # identity (Cin == Cout)

        out_ref[...] = (out2 + res).astype(out_ref.dtype).reshape(b_blk, H, WC_out)

    return kernel


# --------------------------- wrapper helpers ---------------------------

def _banded_conv_weights_fused(w, W_sp):
    """OIHW 3x3 conv weights -> (W*Cin, 3*W*Cout) block-Toeplitz matrix.

    For each kernel row kh:
      M_kh[wi*Cin + ci, wo*Cout + co] = w[co, ci, kh, wi - wo + 1]
    for wi - wo + 1 in {0,1,2}, else 0 (width zero-pad == band structure).
    The three kh matrices are concatenated along the output/lane dim so the
    kernel issues a single wide MXU matmul per conv.
    """
    Cout, Cin, KH, KW = w.shape
    mats = []
    for kh in range(KH):
        m = jnp.zeros((W_sp, Cin, W_sp, Cout), jnp.float32)
        for kw in range(KW):
            band = jnp.eye(W_sp, W_sp, k=1 - kw, dtype=jnp.float32)
            kT = w[:, :, kh, kw].T.astype(jnp.float32)               # (Cin, Cout)
            m = m + jnp.einsum("io,cd->icod", band, kT)
        mats.append(m.reshape(W_sp * Cin, W_sp * Cout))
    return jnp.concatenate(mats, axis=1)                              # (WCin, 3*WCout)


def _blockdiag_1x1_weight(wd, W_sp):
    """1x1 conv OIHW weights -> block-diagonal (W*Cin, W*Cout) matrix."""
    Cout, Cin = wd.shape[0], wd.shape[1]
    eye = jnp.eye(W_sp, dtype=jnp.float32)
    kT = wd.reshape(Cout, Cin).T.astype(jnp.float32)
    return jnp.einsum("io,cd->icod", eye, kT).reshape(W_sp * Cin, W_sp * Cout)


def _fold_bn_tiled(gamma, beta, mean, var, W_sp, eps=1e-5):
    """Fold BN (inference, running stats) into scale/bias tiled to lane width."""
    scale = gamma / jnp.sqrt(var + eps)
    bias = beta - mean * scale
    return (jnp.tile(scale, W_sp).reshape(1, -1).astype(jnp.float32),
            jnp.tile(bias, W_sp).reshape(1, -1).astype(jnp.float32))


def _pick_batch_block(N, H, max_rows=512):
    """Largest divisor b of N with b*H rows per matmul and (N>=2) grid >= 2."""
    best = 1
    for b in range(1, N + 1):
        if N % b != 0:
            continue
        if b * H > max_rows:
            continue
        if N >= 2 and N // b < 2:
            continue
        best = b
    return best


def _vmem_limit(b_blk, H, WC_in, WC_out, has_downsample):
    bf16 = 2
    x_blk = 2 * b_blk * H * WC_in * bf16                 # double-buffered input
    o_blk = 2 * b_blk * H * WC_out * bf16                # double-buffered output
    w = (WC_in + WC_out) * 3 * WC_out * bf16             # fused conv weights
    if has_downsample:
        w += WC_in * WC_out * bf16
    sb = 8 * WC_out * 4                                  # folded BN scale/bias
    interm = 8 * b_blk * H * max(WC_in, 3 * WC_out) * 4  # f32 temporaries
    budget = int(1.5 * (x_blk + o_blk + 2 * w + sb + interm)) + (8 << 20)
    return min(max(budget, 16 << 20), 48 << 20)          # stay under v7x's 64 MiB


def _const_spec(shape, buffer_count):
    idx = lambda n: tuple(0 for _ in shape)
    if buffer_count is None:
        return pl.BlockSpec(shape, idx)
    # Constant index_map across the grid -> single-buffer (no wasted VMEM copy).
    return pl.BlockSpec(shape, idx, pipeline_mode=pl.Buffered(buffer_count))


def _pallas_forward(x, w1, s1, b1, w2, s2, b2, ds, b_blk, H, WC_in, WC_out,
                    weight_buffer_count):
    N = x.shape[0]
    has_downsample = ds is not None
    cs = lambda shape: _const_spec(shape, weight_buffer_count)

    inputs = [x, w1, s1, b1, w2, s2, b2]
    in_specs = [
        pl.BlockSpec((b_blk, H, WC_in), lambda n: (n, 0, 0)),
        cs(w1.shape), cs(s1.shape), cs(b1.shape),
        cs(w2.shape), cs(s2.shape), cs(b2.shape),
    ]
    if has_downsample:
        wd, sd, bd = ds
        inputs += [wd, sd, bd]
        in_specs += [cs(wd.shape), cs(sd.shape), cs(bd.shape)]

    kernel = _make_block_kernel(has_downsample, H, WC_out)
    return pl.pallas_call(
        kernel,
        out_shape=jax.ShapeDtypeStruct((N, H, WC_out), jnp.bfloat16),
        grid_spec=pltpu.PrefetchScalarGridSpec(
            num_scalar_prefetch=0,
            grid=(N // b_blk,),
            in_specs=in_specs,
            out_specs=pl.BlockSpec((b_blk, H, WC_out), lambda n: (n, 0, 0)),
        ),
        compiler_params=pltpu.CompilerParams(
            dimension_semantics=("parallel",),
            vmem_limit_bytes=_vmem_limit(b_blk, H, WC_in, WC_out, has_downsample),
        ),
    )(*inputs)


def basic_block_no_relu_folded(x_folded, params, has_downsample, W, *,
                               eps=1e-5, b_blk=None):
    """Lane-folded NHWC entry point: x_folded (N, H, W*Cin) -> (N, H, W*Cout) bf16."""
    N, H, WC_in = x_folded.shape
    Cin = WC_in // W
    Cout = params["w1"].shape[0]
    WC_out = W * Cout
    if not has_downsample and Cin != Cout:
        raise ValueError("identity residual requires Cin == Cout")

    w1 = _banded_conv_weights_fused(params["w1"], W).astype(jnp.bfloat16)
    w2 = _banded_conv_weights_fused(params["w2"], W).astype(jnp.bfloat16)
    s1, b1 = _fold_bn_tiled(params["g1"], params["b1"], params["m1"], params["v1"], W, eps)
    s2, b2 = _fold_bn_tiled(params["g2"], params["b2"], params["m2"], params["v2"], W, eps)
    ds = None
    if has_downsample:
        wd = _blockdiag_1x1_weight(params["wd"], W).astype(jnp.bfloat16)
        sd, bd = _fold_bn_tiled(params["gd"], params["bd"], params["md"], params["vd"], W, eps)
        ds = (wd, sd, bd)

    if b_blk is None:
        b_blk = _pick_batch_block(N, H)
    x = x_folded.astype(jnp.bfloat16)

    try:
        return _pallas_forward(x, w1, s1, b1, w2, s2, b2, ds,
                               b_blk, H, WC_in, WC_out, weight_buffer_count=1)
    except Exception:
        # TODO(synk): some JAX versions reject single-buffered pipeline_mode on
        # pallas_call BlockSpecs; fall back to default double buffering.
        return _pallas_forward(x, w1, s1, b1, w2, s2, b2, ds,
                               b_blk, H, WC_in, WC_out, weight_buffer_count=None)


def basic_block_no_relu(x_nchw, params, has_downsample, eps=1e-5):
    """PyTorch-facing NCHW wrapper around the lane-folded kernel."""
    # TODO(synk): in a full model keep the lane-folded NHWC layout across blocks
    # (call basic_block_no_relu_folded directly) and drop these transposes.
    N, Cin, H, W = x_nchw.shape
    Cout = params["w1"].shape[0]
    x = jnp.transpose(x_nchw, (0, 2, 3, 1)).reshape(N, H, W * Cin)
    out = basic_block_no_relu_folded(x, params, has_downsample, W, eps=eps)
    return jnp.transpose(out.reshape(N, H, W, Cout), (0, 3, 1, 2)).astype(jnp.float32)


# ---------------- reference (plain JAX f32, NCHW like PyTorch) ----------------

def ref_forward(x_nchw, p, has_downsample, eps=1e-5):
    x = x_nchw.astype(jnp.float32)

    def conv(inp, w, pad):
        return jax.lax.conv_general_dilated(
            inp, w, (1, 1), ((pad, pad), (pad, pad)),
            dimension_numbers=("NCHW", "OIHW", "NCHW"),
            precision=jax.lax.Precision.HIGHEST)

    def bn(inp, g, b, m, v):
        s = g / jnp.sqrt(v + eps)
        return inp * s[None, :, None, None] + (b - m * s)[None, :, None, None]

    out = jnp.maximum(bn(conv(x, p["w1"], 1), p["g1"], p["b1"], p["m1"], p["v1"]), 0.0)
    out = bn(conv(out, p["w2"], 1), p["g2"], p["b2"], p["m2"], p["v2"])
    if has_downsample:
        res = bn(conv(x, p["wd"], 0), p["gd"], p["bd"], p["md"], p["vd"])
    else:
        res = x
    return out + res


def init_params(key, Cin, Cout, has_downsample):
    keys = jax.random.split(key, 6)

    def conv_w(k, co, ci, kh, kw):
        fan = ci * kh * kw
        return jax.random.normal(k, (co, ci, kh, kw), jnp.float32) / jnp.sqrt(fan)

    def bn_p(k, c):
        k1, k2, k3, k4 = jax.random.split(k, 4)
        gamma = 1.0 + 0.1 * jax.random.normal(k1, (c,), jnp.float32)
        beta = 0.1 * jax.random.normal(k2, (c,), jnp.float32)
        mean = 0.1 * jax.random.normal(k3, (c,), jnp.float32)
        var = jnp.abs(jax.random.normal(k4, (c,), jnp.float32)) + 0.5
        return gamma, beta, mean, var

    p = {}
    p["w1"] = conv_w(keys[0], Cout, Cin, 3, 3)
    p["g1"], p["b1"], p["m1"], p["v1"] = bn_p(keys[1], Cout)
    p["w2"] = conv_w(keys[2], Cout, Cout, 3, 3)
    p["g2"], p["b2"], p["m2"], p["v2"] = bn_p(keys[3], Cout)
    if has_downsample:
        p["wd"] = conv_w(keys[4], Cout, Cin, 1, 1)
        p["gd"], p["bd"], p["md"], p["vd"] = bn_p(keys[5], Cout)
    return p


if __name__ == "__main__":
    key = jax.random.PRNGKey(0)
    kx, kp1, kp2 = jax.random.split(key, 3)

    # batch=4 -> 2 grid steps of 2-image blocks (M = 32 matmul rows per step,
    # and both v7x TensorCores get a step); Cin=8, 16x16 spatial -> W*Cin = 128.
    x = jax.random.normal(kx, (4, 8, 16, 16), jnp.float32)

    # bf16 activations/weights/output with f32 accumulation vs f32 reference.
    RTOL, ATOL = 3e-2, 3e-2

    # Case 1: downsample=None (identity residual), Cout == Cin.
    p_id = init_params(kp1, 8, 8, has_downsample=False)
    out_id = jax.block_until_ready(basic_block_no_relu(x, p_id, False))
    ref_id = ref_forward(x, p_id, False)
    assert out_id.shape == ref_id.shape
    assert bool(jnp.allclose(out_id, ref_id, rtol=RTOL, atol=ATOL)), \
        float(jnp.max(jnp.abs(out_id - ref_id)))

    # Case 2: downsample = 1x1 conv + BN changing channels 8 -> 16.
    p_ds = init_params(kp2, 8, 16, has_downsample=True)
    out_ds = jax.block_until_ready(basic_block_no_relu(x, p_ds, True))
    ref_ds = ref_forward(x, p_ds, True)
    assert out_ds.shape == ref_ds.shape
    assert bool(jnp.allclose(out_ds, ref_ds, rtol=RTOL, atol=ATOL)), \
        float(jnp.max(jnp.abs(out_ds - ref_ds)))

    print("KERNEL_OK")
</pallas_src>

<mosaic_0001>
module attributes {stable_mosaic.version = 11 : i64} {
  func.func @kernel(%arg0: i32, %arg1: memref<2x16x128xbf16, #tpu.memory_space<vmem>>, %arg2: memref<128x384xbf16, #tpu.memory_space<vmem>>, %arg3: memref<1x128xf32, #tpu.memory_space<vmem>>, %arg4: memref<1x128xf32, #tpu.memory_space<vmem>>, %arg5: memref<128x384xbf16, #tpu.memory_space<vmem>>, %arg6: memref<1x128xf32, #tpu.memory_space<vmem>>, %arg7: memref<1x128xf32, #tpu.memory_space<vmem>>, %arg8: memref<2x16x128xbf16, #tpu.memory_space<vmem>>) attributes {dimension_semantics = [#tpu.dimension_semantics<parallel>], iteration_bounds = array<i64: 2>, scalar_prefetch = 0 : i64, scratch_operands = 0 : i64, tpu.core_type = #tpu.core_type<tc>, window_params = [{transform_indices = @transform_0, window_bounds = array<i64: 2, 16, 128>}, {pipeline_mode = #tpu.pipeline_mode<synchronous>, transform_indices = @transform_1, window_bounds = array<i64: 128, 384>}, {pipeline_mode = #tpu.pipeline_mode<synchronous>, transform_indices = @transform_2, window_bounds = array<i64: 1, 128>}, {pipeline_mode = #tpu.pipeline_mode<synchronous>, transform_indices = @transform_3, window_bounds = array<i64: 1, 128>}, {pipeline_mode = #tpu.pipeline_mode<synchronous>, transform_indices = @transform_4, window_bounds = array<i64: 128, 384>}, {pipeline_mode = #tpu.pipeline_mode<synchronous>, transform_indices = @transform_5, window_bounds = array<i64: 1, 128>}, {pipeline_mode = #tpu.pipeline_mode<synchronous>, transform_indices = @transform_6, window_bounds = array<i64: 1, 128>}, {transform_indices = @transform_7, window_bounds = array<i64: 2, 16, 128>}]} {
    %c0 = arith.constant 0 : index
    %c0_0 = arith.constant 0 : index
    %c0_1 = arith.constant 0 : index
    %0 = vector.load %arg1[%c0, %c0_0, %c0_1] : memref<2x16x128xbf16, #tpu.memory_space<vmem>>, vector<2x16x128xbf16>
    %1 = vector.shape_cast %0 : vector<2x16x128xbf16> to vector<32x128xbf16>
    %c0_2 = arith.constant 0 : index
    %c0_3 = arith.constant 0 : index
    %2 = vector.load %arg2[%c0_2, %c0_3] : memref<128x384xbf16, #tpu.memory_space<vmem>>, vector<128x384xbf16>
    %cst = arith.constant dense<0.000000e+00> : vector<32x384xf32>
    %3 = tpu.matmul %1, %2, %cst {dimension_numbers = #tpu.dot_dimension_numbers<[1], [0], [0], [1], [0, 0, 1, 1], [], []>} : vector<32x128xbf16>, vector<128x384xbf16>, vector<32x384xf32> -> vector<32x384xf32>
    %4 = vector.extract_strided_slice %3 {offsets = [0, 0], sizes = [32, 128], strides = [1, 1]} : vector<32x384xf32> to vector<32x128xf32>
    %5 = vector.extract_strided_slice %3 {offsets = [0, 128], sizes = [32, 128], strides = [1, 1]} : vector<32x384xf32> to vector<32x128xf32>
    %6 = vector.extract_strided_slice %3 {offsets = [0, 256], sizes = [32, 128], strides = [1, 1]} : vector<32x384xf32> to vector<32x128xf32>
    %7 = tpu.iota {dimensions = array<i32: 0>} : vector<32x1xi32>
    %c16_i32 = arith.constant 16 : i32
    %c0_i32 = arith.constant 0 : i32
    %8 = arith.cmpi eq, %c16_i32, %c0_i32 : i32
    %c1_i32 = arith.constant 1 : i32
    %9 = arith.select %8, %c1_i32, %c16_i32 : i32
    %10 = vector.broadcast %9 : i32 to vector<32x1xi32>
    %11 = arith.remsi %7, %10 : vector<32x1xi32>
    %c0_i32_4 = arith.constant 0 : i32
    %12 = vector.broadcast %c0_i32_4 : i32 to vector<32x1xi32>
    %13 = arith.cmpi ne, %11, %12 : vector<32x1xi32>
    %c0_i32_5 = arith.constant 0 : i32
    %14 = vector.broadcast %c0_i32_5 : i32 to vector<32x1xi32>
    %15 = arith.cmpi slt, %11, %14 : vector<32x1xi32>
    %c0_i32_6 = arith.constant 0 : i32
    %16 = arith.cmpi slt, %9, %c0_i32_6 : i32
    %17 = vector.broadcast %16 : i1 to vector<32x1xi1>
    %18 = vector.broadcast %17 : vector<32x1xi1> to vector<32x1xi1>
    %19 = arith.xori %15, %18 : vector<32x1xi1>
    %20 = arith.andi %19, %13 : vector<32x1xi1>
    %21 = vector.broadcast %9 : i32 to vector<32x1xi32>
    %22 = arith.addi %11, %21 : vector<32x1xi32>
    %23 = arith.select %20, %22, %11 : vector<32x1xi1>, vector<32x1xi32>
    %c0_i32_7 = arith.constant 0 : i32
    %24 = vector.broadcast %c0_i32_7 : i32 to vector<32x1xi32>
    %25 = arith.cmpi ne, %23, %24 : vector<32x1xi32>
    %c1_i32_8 = arith.constant 1 : i32
    %26 = tpu.dynamic_rotate %4 by %c1_i32_8 dim 0 : vector<32x128xf32>, i32 -> vector<32x128xf32>
    %cst_9 = arith.constant 0.000000e+00 : f32
    %27 = vector.shape_cast %25 : vector<32x1xi1> to vector<32x1xi1>
    %28 = vector.broadcast %27 : vector<32x1xi1> to vector<32x128xi1>
    %29 = vector.broadcast %cst_9 : f32 to vector<32x128xf32>
    %30 = arith.select %28, %26, %29 : vector<32x128xi1>, vector<32x128xf32>
    %c16_i32_10 = arith.constant 16 : i32
    %c0_i32_11 = arith.constant 0 : i32
    %31 = arith.cmpi eq, %c16_i32_10, %c0_i32_11 : i32
    %c1_i32_12 = arith.constant 1 : i32
    %32 = arith.select %31, %c1_i32_12, %c16_i32_10 : i32
    %33 = vector.broadcast %32 : i32 to vector<32x1xi32>
    %34 = arith.remsi %7, %33 : vector<32x1xi32>
    %c0_i32_13 = arith.constant 0 : i32
    %35 = vector.broadcast %c0_i32_13 : i32 to vector<32x1xi32>
    %36 = arith.cmpi ne, %34, %35 : vector<32x1xi32>
    %c0_i32_14 = arith.constant 0 : i32
    %37 = vector.broadcast %c0_i32_14 : i32 to vector<32x1xi32>
    %38 = arith.cmpi slt, %34, %37 : vector<32x1xi32>
    %c0_i32_15 = arith.constant 0 : i32
    %39 = arith.cmpi slt, %32, %c0_i32_15 : i32
    %40 = vector.broadcast %39 : i1 to vector<32x1xi1>
    %41 = vector.broadcast %40 : vector<32x1xi1> to vector<32x1xi1>
    %42 = arith.xori %38, %41 : vector<32x1xi1>
    %43 = arith.andi %42, %36 : vector<32x1xi1>
    %44 = vector.broadcast %32 : i32 to vector<32x1xi32>
    %45 = arith.addi %34, %44 : vector<32x1xi32>
    %46 = arith.select %43, %45, %34 : vector<32x1xi1>, vector<32x1xi32>
    %c15_i32 = arith.constant 15 : i32
    %47 = vector.broadcast %c15_i32 : i32 to vector<32x1xi32>
    %48 = arith.cmpi ne, %46, %47 : vector<32x1xi32>
    %c31_i32 = arith.constant 31 : i32
    %49 = tpu.dynamic_rotate %6 by %c31_i32 dim 0 : vector<32x128xf32>, i32 -> vector<32x128xf32>
    %cst_16 = arith.constant 0.000000e+00 : f32
    %50 = vector.shape_cast %48 : vector<32x1xi1> to vector<32x1xi1>
    %51 = vector.broadcast %50 : vector<32x1xi1> to vector<32x128xi1>
    %52 = vector.broadcast %cst_16 : f32 to vector<32x128xf32>
    %53 = arith.select %51, %49, %52 : vector<32x128xi1>, vector<32x128xf32>
    %54 = arith.addf %30, %5 : vector<32x128xf32>
    %55 = arith.addf %54, %53 : vector<32x128xf32>
    %c0_17 = arith.constant 0 : index
    %c0_18 = arith.constant 0 : index
    %56 = vector.load %arg3[%c0_17, %c0_18] : memref<1x128xf32, #tpu.memory_space<vmem>>, vector<1x128xf32>
    %57 = vector.broadcast %56 : vector<1x128xf32> to vector<32x128xf32>
    %58 = arith.mulf %55, %57 : vector<32x128xf32>
    %c0_19 = arith.constant 0 : index
    %c0_20 = arith.constant 0 : index
    %59 = vector.load %arg4[%c0_19, %c0_20] : memref<1x128xf32, #tpu.memory_space<vmem>>, vector<1x128xf32>
    %60 = vector.broadcast %59 : vector<1x128xf32> to vector<32x128xf32>
    %61 = arith.addf %58, %60 : vector<32x128xf32>
    %cst_21 = arith.constant 0.000000e+00 : f32
    %62 = vector.broadcast %cst_21 : f32 to vector<32x128xf32>
    %63 = arith.maximumf %61, %62 : vector<32x128xf32>
    %64 = arith.truncf %63 : vector<32x128xf32> to vector<32x128xbf16>
    %c0_22 = arith.constant 0 : index
    %c0_23 = arith.constant 0 : index
    %65 = vector.load %arg5[%c0_22, %c0_23] : memref<128x384xbf16, #tpu.memory_space<vmem>>, vector<128x384xbf16>
    %cst_24 = arith.constant dense<0.000000e+00> : vector<32x384xf32>
    %66 = tpu.matmul %64, %65, %cst_24 {dimension_numbers = #tpu.dot_dimension_numbers<[1], [0], [0], [1], [0, 0, 1, 1], [], []>} : vector<32x128xbf16>, vector<128x384xbf16>, vector<32x384xf32> -> vector<32x384xf32>
    %67 = vector.extract_strided_slice %66 {offsets = [0, 0], sizes = [32, 128], strides = [1, 1]} : vector<32x384xf32> to vector<32x128xf32>
    %68 = vector.extract_strided_slice %66 {offsets = [0, 128], sizes = [32, 128], strides = [1, 1]} : vector<32x384xf32> to vector<32x128xf32>
    %69 = vector.extract_strided_slice %66 {offsets = [0, 256], sizes = [32, 128], strides = [1, 1]} : vector<32x384xf32> to vector<32x128xf32>
    %70 = tpu.iota {dimensions = array<i32: 0>} : vector<32x1xi32>
    %c16_i32_25 = arith.constant 16 : i32
    %c0_i32_26 = arith.constant 0 : i32
    %71 = arith.cmpi eq, %c16_i32_25, %c0_i32_26 : i32
    %c1_i32_27 = arith.constant 1 : i32
    %72 = arith.select %71, %c1_i32_27, %c16_i32_25 : i32
    %73 = vector.broadcast %72 : i32 to vector<32x1xi32>
    %74 = arith.remsi %70, %73 : vector<32x1xi32>
    %c0_i32_28 = arith.constant 0 : i32
    %75 = vector.broadcast %c0_i32_28 : i32 to vector<32x1xi32>
    %76 = arith.cmpi ne, %74, %75 : vector<32x1xi32>
    %c0_i32_29 = arith.constant 0 : i32
    %77 = vector.broadcast %c0_i32_29 : i32 to vector<32x1xi32>
    %78 = arith.cmpi slt, %74, %77 : vector<32x1xi32>
    %c0_i32_30 = arith.constant 0 : i32
    %79 = arith.cmpi slt, %72, %c0_i32_30 : i32
    %80 = vector.broadcast %79 : i1 to vector<32x1xi1>
    %81 = vector.broadcast %80 : vector<32x1xi1> to vector<32x1xi1>
    %82 = arith.xori %78, %81 : vector<32x1xi1>
    %83 = arith.andi %82, %76 : vector<32x1xi1>
    %84 = vector.broadcast %72 : i32 to vector<32x1xi32>
    %85 = arith.addi %74, %84 : vector<32x1xi32>
    %86 = arith.select %83, %85, %74 : vector<32x1xi1>, vector<32x1xi32>
    %c0_i32_31 = arith.constant 0 : i32
    %87 = vector.broadcast %c0_i32_31 : i32 to vector<32x1xi32>
    %88 = arith.cmpi ne, %86, %87 : vector<32x1xi32>
    %c1_i32_32 = arith.constant 1 : i32
    %89 = tpu.dynamic_rotate %67 by %c1_i32_32 dim 0 : vector<32x128xf32>, i32 -> vector<32x128xf32>
    %cst_33 = arith.constant 0.000000e+00 : f32
    %90 = vector.shape_cast %88 : vector<32x1xi1> to vector<32x1xi1>
    %91 = vector.broadcast %90 : vector<32x1xi1> to vector<32x128xi1>
    %92 = vector.broadcast %cst_33 : f32 to vector<32x128xf32>
    %93 = arith.select %91, %89, %92 : vector<32x128xi1>, vector<32x128xf32>
    %c16_i32_34 = arith.constant 16 : i32
    %c0_i32_35 = arith.constant 0 : i32
    %94 = arith.cmpi eq, %c16_i32_34, %c0_i32_35 : i32
    %c1_i32_36 = arith.constant 1 : i32
    %95 = arith.select %94, %c1_i32_36, %c16_i32_34 : i32
    %96 = vector.broadcast %95 : i32 to vector<32x1xi32>
    %97 = arith.remsi %70, %96 : vector<32x1xi32>
    %c0_i32_37 = arith.constant 0 : i32
    %98 = vector.broadcast %c0_i32_37 : i32 to vector<32x1xi32>
    %99 = arith.cmpi ne, %97, %98 : vector<32x1xi32>
    %c0_i32_38 = arith.constant 0 : i32
    %100 = vector.broadcast %c0_i32_38 : i32 to vector<32x1xi32>
    %101 = arith.cmpi slt, %97, %100 : vector<32x1xi32>
    %c0_i32_39 = arith.constant 0 : i32
    %102 = arith.cmpi slt, %95, %c0_i32_39 : i32
    %103 = vector.broadcast %102 : i1 to vector<32x1xi1>
    %104 = vector.broadcast %103 : vector<32x1xi1> to vector<32x1xi1>
    %105 = arith.xori %101, %104 : vector<32x1xi1>
    %106 = arith.andi %105, %99 : vector<32x1xi1>
    %107 = vector.broadcast %95 : i32 to vector<32x1xi32>
    %108 = arith.addi %97, %107 : vector<32x1xi32>
    %109 = arith.select %106, %108, %97 : vector<32x1xi1>, vector<32x1xi32>
    %c15_i32_40 = arith.constant 15 : i32
    %110 = vector.broadcast %c15_i32_40 : i32 to vector<32x1xi32>
    %111 = arith.cmpi ne, %109, %110 : vector<32x1xi32>
    %c31_i32_41 = arith.constant 31 : i32
    %112 = tpu.dynamic_rotate %69 by %c31_i32_41 dim 0 : vector<32x128xf32>, i32 -> vector<32x128xf32>
    %cst_42 = arith.constant 0.000000e+00 : f32
    %113 = vector.shape_cast %111 : vector<32x1xi1> to vector<32x1xi1>
    %114 = vector.broadcast %113 : vector<32x1xi1> to vector<32x128xi1>
    %115 = vector.broadcast %cst_42 : f32 to vector<32x128xf32>
    %116 = arith.select %114, %112, %115 : vector<32x128xi1>, vector<32x128xf32>
    %117 = arith.addf %93, %68 : vector<32x128xf32>
    %118 = arith.addf %117, %116 : vector<32x128xf32>
    %c0_43 = arith.constant 0 : index
    %c0_44 = arith.constant 0 : index
    %119 = vector.load %arg6[%c0_43, %c0_44] : memref<1x128xf32, #tpu.memory_space<vmem>>, vector<1x128xf32>
    %120 = vector.broadcast %119 : vector<1x128xf32> to vector<32x128xf32>
    %121 = arith.mulf %118, %120 : vector<32x128xf32>
    %c0_45 = arith.constant 0 : index
    %c0_46 = arith.constant 0 : index
    %122 = vector.load %arg7[%c0_45, %c0_46] : memref<1x128xf32, #tpu.memory_space<vmem>>, vector<1x128xf32>
    %123 = vector.broadcast %122 : vector<1x128xf32> to vector<32x128xf32>
    %124 = arith.addf %121, %123 : vector<32x128xf32>
    %125 = arith.extf %1 : vector<32x128xbf16> to vector<32x128xf32>
    %126 = arith.addf %124, %125 : vector<32x128xf32>
    %127 = arith.truncf %126 : vector<32x128xf32> to vector<32x128xbf16>
    %128 = vector.shape_cast %127 : vector<32x128xbf16> to vector<2x16x128xbf16>
    %c0_47 = arith.constant 0 : index
    %c0_48 = arith.constant 0 : index
    %c0_49 = arith.constant 0 : index
    %129 = vector.load %arg8[%c0_47, %c0_48, %c0_49] : memref<2x16x128xbf16, #tpu.memory_space<vmem>>, vector<2x16x128xbf16>
    tpu.vector_store %arg8[%c0_47, %c0_48, %c0_49], %128 {strides = array<i32>} : memref<2x16x128xbf16, #tpu.memory_space<vmem>>, vector<2x16x128xbf16>,
    return
  }
  func.func @transform_0(%arg0: i32) -> (i32, i32, i32) {
    %c0_i32 = arith.constant 0 : i32
    %c0_i32_0 = arith.constant 0 : i32
    %c0_i32_1 = arith.constant 0 : i32
    return %arg0, %c0_i32, %c0_i32_0 : i32, i32, i32
  }
  func.func @transform_1(%arg0: i32) -> (i32, i32) {
    %c0_i32 = arith.constant 0 : i32
    %c0_i32_0 = arith.constant 0 : i32
    %c0_i32_1 = arith.constant 0 : i32
    return %c0_i32, %c0_i32_0 : i32, i32
  }
  func.func @transform_2(%arg0: i32) -> (i32, i32) {
    %c0_i32 = arith.constant 0 : i32
    %c0_i32_0 = arith.constant 0 : i32
    %c0_i32_1 = arith.constant 0 : i32
    return %c0_i32, %c0_i32_0 : i32, i32
  }
  func.func @transform_3(%arg0: i32) -> (i32, i32) {
    %c0_i32 = arith.constant 0 : i32
    %c0_i32_0 = arith.constant 0 : i32
    %c0_i32_1 = arith.constant 0 : i32
    return %c0_i32, %c0_i32_0 : i32, i32
  }
  func.func @transform_4(%arg0: i32) -> (i32, i32) {
    %c0_i32 = arith.constant 0 : i32
    %c0_i32_0 = arith.constant 0 : i32
    %c0_i32_1 = arith.constant 0 : i32
    return %c0_i32, %c0_i32_0 : i32, i32
  }
  func.func @transform_5(%arg0: i32) -> (i32, i32) {
    %c0_i32 = arith.constant 0 : i32
    %c0_i32_0 = arith.constant 0 : i32
    %c0_i32_1 = arith.constant 0 : i32
    return %c0_i32, %c0_i32_0 : i32, i32
  }
  func.func @transform_6(%arg0: i32) -> (i32, i32) {
    %c0_i32 = arith.constant 0 : i32
    %c0_i32_0 = arith.constant 0 : i32
    %c0_i32_1 = arith.constant 0 : i32
    return %c0_i32, %c0_i32_0 : i32, i32
  }
  func.func @transform_7(%arg0: i32) -> (i32, i32, i32) {
    %c0_i32 = arith.constant 0 : i32
    %c0_i32_0 = arith.constant 0 : i32
    %c0_i32_1 = arith.constant 0 : i32
    return %arg0, %c0_i32, %c0_i32_0 : i32, i32, i32
  }
}

module attributes {stable_mosaic.version = 11 : i64} {
  func.func @kernel(%arg0: i32, %arg1: memref<2x16x128xbf16, #tpu.memory_space<vmem>>, %arg2: memref<128x384xbf16, #tpu.memory_space<vmem>>, %arg3: memref<1x128xf32, #tpu.memory_space<vmem>>, %arg4: memref<1x128xf32, #tpu.memory_space<vmem>>, %arg5: memref<128x384xbf16, #tpu.memory_space<vmem>>, %arg6: memref<1x128xf32, #tpu.memory_space<vmem>>, %arg7: memref<1x128xf32, #tpu.memory_space<vmem>>, %arg8: memref<2x16x128xbf16, #tpu.memory_space<vmem>>) attributes {dimension_semantics = [#tpu.dimension_semantics<parallel>], iteration_bounds = array<i64: 2>, scalar_prefetch = 0 : i64, scratch_operands = 0 : i64, tpu.core_type = #tpu.core_type<tc>, window_params = [{transform_indices = @transform_0, window_bounds = array<i64: 2, 16, 128>}, {pipeline_mode = #tpu.pipeline_mode<synchronous>, transform_indices = @transform_1, window_bounds = array<i64: 128, 384>}, {pipeline_mode = #tpu.pipeline_mode<synchronous>, transform_indices = @transform_2, window_bounds = array<i64: 1, 128>}, {pipeline_mode = #tpu.pipeline_mode<synchronous>, transform_indices = @transform_3, window_bounds = array<i64: 1, 128>}, {pipeline_mode = #tpu.pipeline_mode<synchronous>, transform_indices = @transform_4, window_bounds = array<i64: 128, 384>}, {pipeline_mode = #tpu.pipeline_mode<synchronous>, transform_indices = @transform_5, window_bounds = array<i64: 1, 128>}, {pipeline_mode = #tpu.pipeline_mode<synchronous>, transform_indices = @transform_6, window_bounds = array<i64: 1, 128>}, {transform_indices = @transform_7, window_bounds = array<i64: 2, 16, 128>}]} {
    %c0 = arith.constant 0 : index
    %c0_0 = arith.constant 0 : index
    %c0_1 = arith.constant 0 : index
    %0 = vector.load %arg1[%c0, %c0_0, %c0_1] : memref<2x16x128xbf16, #tpu.memory_space<vmem>>, vector<2x16x128xbf16>
    %1 = vector.shape_cast %0 : vector<2x16x128xbf16> to vector<32x128xbf16>
    %c0_2 = arith.constant 0 : index
    %c0_3 = arith.constant 0 : index
    %2 = vector.load %arg2[%c0_2, %c0_3] : memref<128x384xbf16, #tpu.memory_space<vmem>>, vector<128x384xbf16>
    %cst = arith.constant dense<0.000000e+00> : vector<32x384xf32>
    %3 = tpu.matmul %1, %2, %cst {dimension_numbers = #tpu.dot_dimension_numbers<[1], [0], [0], [1], [0, 0, 1, 1], [], []>} : vector<32x128xbf16>, vector<128x384xbf16>, vector<32x384xf32> -> vector<32x384xf32>
    %4 = vector.extract_strided_slice %3 {offsets = [0, 0], sizes = [32, 128], strides = [1, 1]} : vector<32x384xf32> to vector<32x128xf32>
    %5 = vector.extract_strided_slice %3 {offsets = [0, 128], sizes = [32, 128], strides = [1, 1]} : vector<32x384xf32> to vector<32x128xf32>
    %6 = vector.extract_strided_slice %3 {offsets = [0, 256], sizes = [32, 128], strides = [1, 1]} : vector<32x384xf32> to vector<32x128xf32>
    %7 = tpu.iota {dimensions = array<i32: 0>} : vector<32x1xi32>
    %c16_i32 = arith.constant 16 : i32
    %c0_i32 = arith.constant 0 : i32
    %8 = arith.cmpi eq, %c16_i32, %c0_i32 : i32
    %c1_i32 = arith.constant 1 : i32
    %9 = arith.select %8, %c1_i32, %c16_i32 : i32
    %10 = vector.broadcast %9 : i32 to vector<32x1xi32>
    %11 = arith.remsi %7, %10 : vector<32x1xi32>
    %c0_i32_4 = arith.constant 0 : i32
    %12 = vector.broadcast %c0_i32_4 : i32 to vector<32x1xi32>
    %13 = arith.cmpi ne, %11, %12 : vector<32x1xi32>
    %c0_i32_5 = arith.constant 0 : i32
    %14 = vector.broadcast %c0_i32_5 : i32 to vector<32x1xi32>
    %15 = arith.cmpi slt, %11, %14 : vector<32x1xi32>
    %c0_i32_6 = arith.constant 0 : i32
    %16 = arith.cmpi slt, %9, %c0_i32_6 : i32
    %17 = vector.broadcast %16 : i1 to vector<32x1xi1>
    %18 = vector.broadcast %17 : vector<32x1xi1> to vector<32x1xi1>
    %19 = arith.xori %15, %18 : vector<32x1xi1>
    %20 = arith.andi %19, %13 : vector<32x1xi1>
    %21 = vector.broadcast %9 : i32 to vector<32x1xi32>
    %22 = arith.addi %11, %21 : vector<32x1xi32>
    %23 = arith.select %20, %22, %11 : vector<32x1xi1>, vector<32x1xi32>
    %c0_i32_7 = arith.constant 0 : i32
    %24 = vector.broadcast %c0_i32_7 : i32 to vector<32x1xi32>
    %25 = arith.cmpi ne, %23, %24 : vector<32x1xi32>
    %c1_i32_8 = arith.constant 1 : i32
    %26 = tpu.dynamic_rotate %4 by %c1_i32_8 dim 0 : vector<32x128xf32>, i32 -> vector<32x128xf32>
    %cst_9 = arith.constant 0.000000e+00 : f32
    %27 = vector.shape_cast %25 : vector<32x1xi1> to vector<32x1xi1>
    %28 = vector.broadcast %27 : vector<32x1xi1> to vector<32x128xi1>
    %29 = vector.broadcast %cst_9 : f32 to vector<32x128xf32>
    %30 = arith.select %28, %26, %29 : vector<32x128xi1>, vector<32x128xf32>
    %c16_i32_10 = arith.constant 16 : i32
    %c0_i32_11 = arith.constant 0 : i32
    %31 = arith.cmpi eq, %c16_i32_10, %c0_i32_11 : i32
    %c1_i32_12 = arith.constant 1 : i32
    %32 = arith.select %31, %c1_i32_12, %c16_i32_10 : i32
    %33 = vector.broadcast %32 : i32 to vector<32x1xi32>
    %34 = arith.remsi %7, %33 : vector<32x1xi32>
    %c0_i32_13 = arith.constant 0 : i32
    %35 = vector.broadcast %c0_i32_13 : i32 to vector<32x1xi32>
    %36 = arith.cmpi ne, %34, %35 : vector<32x1xi32>
    %c0_i32_14 = arith.constant 0 : i32
    %37 = vector.broadcast %c0_i32_14 : i32 to vector<32x1xi32>
    %38 = arith.cmpi slt, %34, %37 : vector<32x1xi32>
    %c0_i32_15 = arith.constant 0 : i32
    %39 = arith.cmpi slt, %32, %c0_i32_15 : i32
    %40 = vector.broadcast %39 : i1 to vector<32x1xi1>
    %41 = vector.broadcast %40 : vector<32x1xi1> to vector<32x1xi1>
    %42 = arith.xori %38, %41 : vector<32x1xi1>
    %43 = arith.andi %42, %36 : vector<32x1xi1>
    %44 = vector.broadcast %32 : i32 to vector<32x1xi32>
    %45 = arith.addi %34, %44 : vector<32x1xi32>
    %46 = arith.select %43, %45, %34 : vector<32x1xi1>, vector<32x1xi32>
    %c15_i32 = arith.constant 15 : i32
    %47 = vector.broadcast %c15_i32 : i32 to vector<32x1xi32>
    %48 = arith.cmpi ne, %46, %47 : vector<32x1xi32>
    %c31_i32 = arith.constant 31 : i32
    %49 = tpu.dynamic_rotate %6 by %c31_i32 dim 0 : vector<32x128xf32>, i32 -> vector<32x128xf32>
    %cst_16 = arith.constant 0.000000e+00 : f32
    %50 = vector.shape_cast %48 : vector<32x1xi1> to vector<32x1xi1>
    %51 = vector.broadcast %50 : vector<32x1xi1> to vector<32x128xi1>
    %52 = vector.broadcast %cst_16 : f32 to vector<32x128xf32>
    %53 = arith.select %51, %49, %52 : vector<32x128xi1>, vector<32x128xf32>
    %54 = arith.addf %30, %5 : vector<32x128xf32>
    %55 = arith.addf %54, %53 : vector<32x128xf32>
    %c0_17 = arith.constant 0 : index
    %c0_18 = arith.constant 0 : index
    %56 = vector.load %arg3[%c0_17, %c0_18] : memref<1x128xf32, #tpu.memory_space<vmem>>, vector<1x128xf32>
    %57 = vector.broadcast %56 : vector<1x128xf32> to vector<32x128xf32>
    %58 = arith.mulf %55, %57 : vector<32x128xf32>
    %c0_19 = arith.constant 0 : index
    %c0_20 = arith.constant 0 : index
    %59 = vector.load %arg4[%c0_19, %c0_20] : memref<1x128xf32, #tpu.memory_space<vmem>>, vector<1x128xf32>
    %60 = vector.broadcast %59 : vector<1x128xf32> to vector<32x128xf32>
    %61 = arith.addf %58, %60 : vector<32x128xf32>
    %cst_21 = arith.constant 0.000000e+00 : f32
    %62 = vector.broadcast %cst_21 : f32 to vector<32x128xf32>
    %63 = arith.maximumf %61, %62 : vector<32x128xf32>
    %64 = arith.truncf %63 : vector<32x128xf32> to vector<32x128xbf16>
    %c0_22 = arith.constant 0 : index
    %c0_23 = arith.constant 0 : index
    %65 = vector.load %arg5[%c0_22, %c0_23] : memref<128x384xbf16, #tpu.memory_space<vmem>>, vector<128x384xbf16>
    %cst_24 = arith.constant dense<0.000000e+00> : vector<32x384xf32>
    %66 = tpu.matmul %64, %65, %cst_24 {dimension_numbers = #tpu.dot_dimension_numbers<[1], [0], [0], [1], [0, 0, 1, 1], [], []>} : vector<32x128xbf16>, vector<128x384xbf16>, vector<32x384xf32> -> vector<32x384xf32>
    %67 = vector.extract_strided_slice %66 {offsets = [0, 0], sizes = [32, 128], strides = [1, 1]} : vector<32x384xf32> to vector<32x128xf32>
    %68 = vector.extract_strided_slice %66 {offsets = [0, 128], sizes = [32, 128], strides = [1, 1]} : vector<32x384xf32> to vector<32x128xf32>
    %69 = vector.extract_strided_slice %66 {offsets = [0, 256], sizes = [32, 128], strides = [1, 1]} : vector<32x384xf32> to vector<32x128xf32>
    %70 = tpu.iota {dimensions = array<i32: 0>} : vector<32x1xi32>
    %c16_i32_25 = arith.constant 16 : i32
    %c0_i32_26 = arith.constant 0 : i32
    %71 = arith.cmpi eq, %c16_i32_25, %c0_i32_26 : i32
    %c1_i32_27 = arith.constant 1 : i32
    %72 = arith.select %71, %c1_i32_27, %c16_i32_25 : i32
    %73 = vector.broadcast %72 : i32 to vector<32x1xi32>
    %74 = arith.remsi %70, %73 : vector<32x1xi32>
    %c0_i32_28 = arith.constant 0 : i32
    %75 = vector.broadcast %c0_i32_28 : i32 to vector<32x1xi32>
    %76 = arith.cmpi ne, %74, %75 : vector<32x1xi32>
    %c0_i32_29 = arith.constant 0 : i32
    %77 = vector.broadcast %c0_i32_29 : i32 to vector<32x1xi32>
    %78 = arith.cmpi slt, %74, %77 : vector<32x1xi32>
    %c0_i32_30 = arith.constant 0 : i32
    %79 = arith.cmpi slt, %72, %c0_i32_30 : i32
    %80 = vector.broadcast %79 : i1 to vector<32x1xi1>
    %81 = vector.broadcast %80 : vector<32x1xi1> to vector<32x1xi1>
    %82 = arith.xori %78, %81 : vector<32x1xi1>
    %83 = arith.andi %82, %76 : vector<32x1xi1>
    %84 = vector.broadcast %72 : i32 to vector<32x1xi32>
    %85 = arith.addi %74, %84 : vector<32x1xi32>
    %86 = arith.select %83, %85, %74 : vector<32x1xi1>, vector<32x1xi32>
    %c0_i32_31 = arith.constant 0 : i32
    %87 = vector.broadcast %c0_i32_31 : i32 to vector<32x1xi32>
    %88 = arith.cmpi ne, %86, %87 : vector<32x1xi32>
    %c1_i32_32 = arith.constant 1 : i32
    %89 = tpu.dynamic_rotate %67 by %c1_i32_32 dim 0 : vector<32x128xf32>, i32 -> vector<32x128xf32>
    %cst_33 = arith.constant 0.000000e+00 : f32
    %90 = vector.shape_cast %88 : vector<32x1xi1> to vector<32x1xi1>
    %91 = vector.broadcast %90 : vector<32x1xi1> to vector<32x128xi1>
    %92 = vector.broadcast %cst_33 : f32 to vector<32x128xf32>
    %93 = arith.select %91, %89, %92 : vector<32x128xi1>, vector<32x128xf32>
    %c16_i32_34 = arith.constant 16 : i32
    %c0_i32_35 = arith.constant 0 : i32
    %94 = arith.cmpi eq, %c16_i32_34, %c0_i32_35 : i32
    %c1_i32_36 = arith.constant 1 : i32
    %95 = arith.select %94, %c1_i32_36, %c16_i32_34 : i32
    %96 = vector.broadcast %95 : i32 to vector<32x1xi32>
    %97 = arith.remsi %70, %96 : vector<32x1xi32>
    %c0_i32_37 = arith.constant 0 : i32
    %98 = vector.broadcast %c0_i32_37 : i32 to vector<32x1xi32>
    %99 = arith.cmpi ne, %97, %98 : vector<32x1xi32>
    %c0_i32_38 = arith.constant 0 : i32
    %100 = vector.broadcast %c0_i32_38 : i32 to vector<32x1xi32>
    %101 = arith.cmpi slt, %97, %100 : vector<32x1xi32>
    %c0_i32_39 = arith.constant 0 : i32
    %102 = arith.cmpi slt, %95, %c0_i32_39 : i32
    %103 = vector.broadcast %102 : i1 to vector<32x1xi1>
    %104 = vector.broadcast %103 : vector<32x1xi1> to vector<32x1xi1>
    %105 = arith.xori %101, %104 : vector<32x1xi1>
    %106 = arith.andi %105, %99 : vector<32x1xi1>
    %107 = vector.broadcast %95 : i32 to vector<32x1xi32>
    %108 = arith.addi %97, %107 : vector<32x1xi32>
    %109 = arith.select %106, %108, %97 : vector<32x1xi1>, vector<32x1xi32>
    %c15_i32_40 = arith.constant 15 : i32
    %110 = vector.broadcast %c15_i32_40 : i32 to vector<32x1xi32>
    %111 = arith.cmpi ne, %109, %110 : vector<32x1xi32>
    %c31_i32_41 = arith.constant 31 : i32
    %112 = tpu.dynamic_rotate %69 by %c31_i32_41 dim 0 : vector<32x128xf32>, i32 -> vector<32x128xf32>
    %cst_42 = arith.constant 0.000000e+00 : f32
    %113 = vector.shape_cast %111 : vector<32x1xi1> to vector<32x1xi1>
    %114 = vector.broadcast %113 : vector<32x1xi1> to vector<32x128xi1>
    %115 = vector.broadcast %cst_42 : f32 to vector<32x128xf32>
    %116 = arith.select %114, %112, %115 : vector<32x128xi1>, vector<32x128xf32>
    %117 = arith.addf %93, %68 : vector<32x128xf32>
    %118 = arith.addf %117, %116 : vector<32x128xf32>
    %c0_43 = arith.constant 0 : index
    %c0_44 = arith.constant 0 : index
    %119 = vector.load %arg6[%c0_43, %c0_44] : memref<1x128xf32, #tpu.memory_space<vmem>>, vector<1x128xf32>
    %120 = vector.broadcast %119 : vector<1x128xf32> to vector<32x128xf32>
    %121 = arith.mulf %118, %120 : vector<32x128xf32>
    %c0_45 = arith.constant 0 : index
    %c0_46 = arith.constant 0 : index
    %122 = vector.load %arg7[%c0_45, %c0_46] : memref<1x128xf32, #tpu.memory_space<vmem>>, vector<1x128xf32>
    %123 = vector.broadcast %122 : vector<1x128xf32> to vector<32x128xf32>
    %124 = arith.addf %121, %123 : vector<32x128xf32>
    %125 = arith.extf %1 : vector<32x128xbf16> to vector<32x128xf32>
    %126 = arith.addf %124, %125 : vector<32x128xf32>
    %127 = arith.truncf %126 : vector<32x128xf32> to vector<32x128xbf16>
    %128 = vector.shape_cast %127 : vector<32x128xbf16> to vector<2x16x128xbf16>
    %c0_47 = arith.constant 0 : index
    %c0_48 = arith.constant 0 : index
    %c0_49 = arith.constant 0 : index
    %129 = vector.load %arg8[%c0_47, %c0_48, %c0_49] : memref<2x16x128xbf16, #tpu.memory_space<vmem>>, vector<2x16x128xbf16>
    tpu.vector_store %arg8[%c0_47, %c0_48, %c0_49], %128 {strides = array<i32>} : memref<2x16x128xbf16, #tpu.memory_space<vmem>>, vector<2x16x128xbf16>,
    return
  }
  func.func @transform_0(%arg0: i32) -> (i32, i32, i32) {
    %c0_i32 = arith.constant 0 : i32
    %c0_i32_0 = arith.constant 0 : i32
    %c0_i32_1 = arith.constant 0 : i32
    return %arg0, %c0_i32, %c0_i32_0 : i32, i32, i32
  }
  func.func @transform_1(%arg0: i32) -> (i32, i32) {
    %c0_i32 = arith.constant 0 : i32
    %c0_i32_0 = arith.constant 0 : i32
    %c0_i32_1 = arith.constant 0 : i32
    return %c0_i32, %c0_i32_0 : i32, i32
  }
  func.func @transform_2(%arg0: i32) -> (i32, i32) {
    %c0_i32 = arith.constant 0 : i32
    %c0_i32_0 = arith.constant 0 : i32
    %c0_i32_1 = arith.constant 0 : i32
    return %c0_i32, %c0_i32_0 : i32, i32
  }
  func.func @transform_3(%arg0: i32) -> (i32, i32) {
    %c0_i32 = arith.constant 0 : i32
    %c0_i32_0 = arith.constant 0 : i32
    %c0_i32_1 = arith.constant 0 : i32
    return %c0_i32, %c0_i32_0 : i32, i32
  }
  func.func @transform_4(%arg0: i32) -> (i32, i32) {
    %c0_i32 = arith.constant 0 : i32
    %c0_i32_0 = arith.constant 0 : i32
    %c0_i32_1 = arith.constant 0 : i32
    return %c0_i32, %c0_i32_0 : i32, i32
  }
  func.func @transform_5(%arg0: i32) -> (i32, i32) {
    %c0_i32 = arith.constant 0 : i32
    %c0_i32_0 = arith.constant 0 : i32
    %c0_i32_1 = arith.constant 0 : i32
    return %c0_i32, %c0_i32_0 : i32, i32
  }
  func.func @transform_6(%arg0: i32) -> (i32, i32) {
    %c0_i32 = arith.constant 0 : i32
    %c0_i32_0 = arith.constant 0 : i32
    %c0_i32_1 = arith.constant 0 : i32
    return %c0_i32, %c0_i32_0 : i32, i32
  }
  func.func @transform_7(%arg0: i32) -> (i32, i32, i32) {
    %c0_i32 = arith.constant 0 : i32
    %c0_i32_0 = arith.constant 0 : i32
    %c0_i32_1 = arith.constant 0 : i32
    return %arg0, %c0_i32, %c0_i32_0 : i32, i32, i32
  }
}

</mosaic_0001>

<bundles_post_ra>
// kernel: tpu_custom_call.1
= control target key start
LH: loop header
LB: loop body
LE: loop exit
PB: predicated region body
PF: predicated region fallthrough
CT: control target
= control target key end

     0   :  { %12 = vsyncpa [#allocation3], 0  ;;  %s2048_s0 = inlined_call_operand.hbm [shape: bf16[4,16,128], index: 0, kind: input, shape index: {}]   ;;  %s2049_s1 = inlined_call_operand.hbm [shape: bf16[128,384], index: 1, kind: input, shape index: {}]   ;;  %s2050_s2 = inlined_call_operand.vmem [shape: f32[1,128], index: 2, kind: input, shape index: {}]   ;;  %s2051_s3 = inlined_call_operand.vmem [shape: f32[1,128], index: 3, kind: input, shape index: {}]   ;;  %s2052_s4 = inlined_call_operand.hbm [shape: bf16[128,384], index: 4, kind: input, shape index: {}]   ;;  %s2053_s5 = inlined_call_operand.vmem [shape: f32[1,128], index: 5, kind: input, shape index: {}]   ;;  %s2054_s6 = inlined_call_operand.vmem [shape: f32[1,128], index: 6, kind: input, shape index: {}]   ;;  %s2055_s7 = inlined_call_operand.hbm [shape: bf16[4,16,128], index: 7, kind: output, shape index: {}]  }
   0x1   :  { %14 = vsyncpa [#allocation3 + $0x1], 0 }
   0x2   :  { %15 = vsyncpa [#allocation6], 0 }
   0x3   :  { %16 = vsyncpa [#allocation4], 0 }
   0x4   :  { %18 = vsyncpa [#allocation4 + $0x1], 0  ;;  %s1706_s24 = smov 0   ;;  %s1708_s25 = smov 0  }
   0x5   :  { %s1710_s26 = smov 0   ;;  %s1712_s27 = smov 0  }
   0x6 LB: > { %s1727_s28 = sadd.s32 4294967295, %s1653_s27   ;;  %s1198_s29 = sadd.s32 4294967294, %s1653_s27   ;;  %s1653_s27 = sphi %s1712_s27, %s2083_s27   ;;  %s1649_s26 = sphi %s1710_s26, %s2082_s26   ;;  %s1645_s25 = sphi %s1708_s25, %s2081_s25   ;;  %s1641_s24 = sphi %s1706_s24, %s2080_s24  }
   0x7   : > { %p44_p0 = scmp.ne.s32.totalorder %s1645_s25, %s1641_s24  ;;  %p2056_p1 = scmp.eq.s32.totalorder %s1727_s28, 0 }
   0x8   : > { %p200_p3 = scmp.eq.s32.totalorder %s1198_s29, 1  ;;  %p1199_p5 = scmp.ge.s32.totalorder %s1653_s27, 1 }
   0x9   : > { %p1736_p4 = por %p2056_p1, %p44_p0  ;;  %p207_p7 = scmp.lt.s32.totalorder %s1653_s27, 3 }
   0xa   : > { %p1741_p6 = por %p200_p3, %p44_p0  ;;  %s1655_s10 = smov [#allocation5]  }
   0xb   : > { %s2059_s30 = scalar_select %p1736_p4, 1, 0 }
   0xc   : > { %s2060_s8 = scalar_select %p1741_p6, 1, 0 }
   0xd   : > { %p1746_p8 = pnand %p1199_p5, %p207_p7  ;;  %s219_s11 = sshll.u32 %s1655_s10, 4  ;;  %s1750_s11 = int_to_ptr.vmem [resolvable:$true] %s219_s11 }
   0xe   : > { %s1656_s13 = smov [#allocation7]   ;;  %s1497_s17 = scalar_lea.hbm %s2049_s1, 3072 }
   0xf   : > { %p1367_p9 = pneg %p1746_p8  ;;  %s238_s14 = sshll.u32 %s1656_s13, 4  ;;  %s1761_s14 = int_to_ptr.vmem [resolvable:$true] %s238_s14 }
  0x10   : > { %p1498_p12 = scmp.ne.s32.totalorder %s2049_s1, %s1497_s17  ;;  %p1504_p5 = scmp.lt.u32.totalorder %s1497_s17, %s2049_s1 }
  0x11   : > { %p1757_p11 = pnand %p1367_p9, %p2056_p1 }
  0x13   : > { %p1499_p13 = pneg %p1757_p11 }
  0x15   : > { %p1500_p0 = pnand %p1499_p13, %p1498_p12 }
  0x17   : > { %p1501_p3 = pneg %p1500_p0 }
  0x19   : > { %p1506_p7 = pnand %p1504_p5, %p1501_p3 }
  0x1b   : > { %1509 = shalt.err (!%p1506_p7)
}
  0x1c   : > { %s1510_s22 = scalar_lea.vmem %s1750_s11, 3072  ;;  %p1518_p2 = scmp.lt.s32.totalorder %s1750_s11, %s1750_s11 }
  0x1d   : > { %p1511_p9 = scmp.ne.s32.totalorder %s1750_s11, %s1510_s22  ;;  %p1519_p12 = scmp.lt.s32.totalorder %s1510_s22, %s1510_s22 }
  0x1f   : > { %p1513_p10 = pnand %p1511_p9, %p1499_p13  ;;  %p1520_p0 = por %p1519_p12, %p1518_p2 }
  0x21   : > { %p1514_p1 = pneg %p1513_p10 }
  0x23   : > { %p1521_p6 = pnand %p1520_p0, %p1514_p1 }
  0x25   : > { %1524 = shalt.err (!%p1521_p6)
}
  0x26   : > { %s1657_s23 = smov 192   ;;  %s1658_s29 = smov 12  }
  0x27   : > { %1370 = dma.hbm_to_vmem [thread:$0]  (!%p1757_p11), %s2049_s1, 3072, %s1750_s11, [#allocation6], %s1657_s23, %s1657_s23, %s1658_s29  }
  0x28   : > { %s1525_s17 = scalar_lea.hbm %s2052_s4, 3072 }
  0x29   : > { %p1526_p2 = scmp.ne.s32.totalorder %s2052_s4, %s1525_s17  ;;  %p1532_p10 = scmp.lt.u32.totalorder %s1525_s17, %s2052_s4 }
  0x2b   : > { %p1528_p1 = pnand %p1526_p2, %p1499_p13 }
  0x2d   : > { %p1529_p6 = pneg %p1528_p1 }
  0x2f   : > { %p1534_p3 = pnand %p1532_p10, %p1529_p6 }
  0x31   : > { %1537 = shalt.err (!%p1534_p3)
}
  0x32   : > { %s1538_s11 = scalar_lea.vmem %s1761_s14, 3072  ;;  %p1546_p12 = scmp.lt.s32.totalorder %s1761_s14, %s1761_s14 }
  0x33   : > { %p1539_p5 = scmp.ne.s32.totalorder %s1761_s14, %s1538_s11  ;;  %p1547_p0 = scmp.lt.s32.totalorder %s1538_s11, %s1538_s11 }
  0x35   : > { %p1541_p7 = pnand %p1539_p5, %p1499_p13  ;;  %p1548_p2 = por %p1547_p0, %p1546_p12 }
  0x37   : > { %p1542_p9 = pneg %p1541_p7 }
  0x39   : > { %p1549_p1 = pnand %p1548_p2, %p1542_p9 }
  0x3b   : > { %1552 = shalt.err (!%p1549_p1)
}
  0x3c   : > { %1373 = dma.hbm_to_vmem [thread:$0]  (!%p1757_p11), %s2052_s4, 3072, %s1761_s14, [#allocation6], %s1657_s23, %s1657_s23, %s1658_s29  }
  0x3d   : > { %s1816_s13 = sadd.s32 1, %s1653_s27   ;;  %s31_s12 = sadd.s32 1, %s1649_s26 }
  0x3e   : > { %s28_s15 = ssub.s32 %s1653_s27, %s1816_s13  ;;  %p38_p13 = scmp.ne.s32.totalorder %s1649_s26, %s1645_s25 }
  0x3f   : > { %p29_p6 = scmp.eq.s32.totalorder %s28_s15, 0  ;;  %p39_p10 = scmp.eq.s32.totalorder %s1653_s27, 0 }
  0x40   : > { %p2063_p3 = scmp.eq.s32.totalorder %s1727_s28, 1  ;;  %p1384_p7 = scmp.lt.s32.totalorder %s1653_s27, 2 }
  0x41   : > { %s1832_s17 = scalar_select %p29_p6, %s1649_s26, %s31_s12  }
  0x42   : > { %p1826_p5 = por %p2063_p3, %p38_p13  ;;  %p40_p9 = por %p39_p10, %p38_p13 }
  0x43   : > { %s258_s18 = sand.u32 1, %s1649_s26   ;;  %s1277_s14 = sshll.u32 %s1653_s27, 8 }
  0x44   : > { %s2064_s16 = scalar_select %p1826_p5, 1, 0 }
  0x45   : > { %s1203_s19 = sshll.u32 %s258_s18, 4  ;;  %s1839_s20 = scalar_lea.hbm %s2048_s0, %s1277_s14 }
  0x46   : > { %s262_s21 = scalar_lea.vmem [#allocation2], %s1203_s19  ;;  %p1843_p11 = pnand %p1384_p7, %p40_p9 }
  0x47   : > { %s270_s11 = sshll.u32 %s262_s21, 4  ;;  %s1847_s10 = scalar_lea.sflag [#allocation3], %s258_s18  ;;  %s1841_s11 = int_to_ptr.vmem [resolvable:$true] %s270_s11 }
  0x48   : > { %s1553_s12 = scalar_lea.hbm %s1839_s20, 256  ;;  %p1555_p0 = pneg %p1843_p11 }
  0x49   : > { %p1554_p12 = scmp.ne.s32.totalorder %s1839_s20, %s1553_s12  ;;  %s1558_s14 = scalar_lea.hbm %s2048_s0, 512 }
  0x4a   : > { %p1559_p13 = scmp.lt.u32.totalorder %s1839_s20, %s2048_s0  ;;  %p1560_p6 = scmp.lt.u32.totalorder %s1558_s14, %s1553_s12 }
  0x4b   : > { %p1556_p2 = pnand %p1555_p0, %p1554_p12  ;;  %p1562_p3 = scmp.lt.u32.totalorder %s1553_s12, %s1839_s20 }
  0x4c   : > { %p1561_p10 = por %p1560_p6, %p1559_p13 }
  0x4d   : > { %p1557_p1 = pneg %p1556_p2 }
  0x4e   : > { %p1563_p7 = por %p1562_p3, %p1561_p10 }
  0x50   : > { %p1564_p9 = pnand %p1563_p7, %p1557_p1 }
  0x52   : > { %1567 = shalt.err (!%p1564_p9)
}
  0x53   : > { %s1568_s18 = scalar_lea.vmem %s1841_s11, 256  ;;  %s1659_s21 = smov [#allocation2]  }
  0x54   : > { %p1569_p12 = scmp.ne.s32.totalorder %s1841_s11, %s1568_s18  ;;  %s1573_s15 = sshll.u32 %s1659_s21, 4  ;;  %s1574_s15 = int_to_ptr.vmem [resolvable:$false] %s1573_s15 }
  0x55   : > { %s1575_s19 = scalar_lea.vmem %s1574_s15, 512  ;;  %p1576_p4 = scmp.lt.s32.totalorder %s1841_s11, %s1574_s15 }
  0x56   : > { %p1571_p2 = pnand %p1569_p12, %p1555_p0  ;;  %p1577_p13 = scmp.lt.s32.totalorder %s1575_s19, %s1568_s18 }
  0x58   : > { %p1572_p5 = pneg %p1571_p2  ;;  %p1578_p6 = por %p1577_p13, %p1576_p4 }
  0x5a   : > { %p1579_p10 = pnand %p1578_p6, %p1572_p5 }
  0x5c   : > { %1582 = shalt.err (!%p1579_p10)
}
  0x5d   : > { %s1660_s12 = smov 64   ;;  %s1661_s14 = smov 4  }
  0x5e   : > { %1377 = dma.hbm_to_vmem [thread:$0]  (!%p1843_p11), %s1839_s20, 256, %s1841_s11, %s1847_s10, %s1660_s12, %s1660_s12, %s1661_s14  }
  0x5f   : > { %282 = sbr.rel (%p1746_p8) target bundleno = 630 (0x276), region = 48  ;;  %s1878_s23 = sand.u32 (!%p1746_p8), 1, %s1645_s25  }
  0x60   : > { %s1208_s29 = sshll.u32 (!%p1746_p8), %s1878_s23, 4  ;;  %s285_s18 = scalar_lea.sflag (!%p1746_p8), [#allocation3], %s1878_s23 }
  0x61   : > { %s1884_s21 = scalar_lea.vmem (!%p1746_p8), [#allocation2], %s1208_s29  ;;  %p2066_p4 = scmp.ne.s32.totalorder (!%p1746_p8), %s2059_s30, 0 }
  0x66   : > { %1628 = dma.done.wait (%p2066_p4), %s285_s18, 256  }
  0x67   : > { %1630 = vsyncadd (%p2066_p4), %s285_s18, 4294967040  ;;  %p2067_p5 = scmp.eq.s32.totalorder %s1727_s28, 0 }
  0x69   : > { %1632 = dma.done.wait (%p2067_p5), [#allocation6], 6144   ;;  %p2068_p8 = pmov %p2067_p5 }
  0x6a   : > { %v1662_v0 = vmov 0   ;;  %v1429_v1 = vld [vmem:[#allocation5 + $0x4] ss:$12 sps:$4 sm:$0xff]   ;;  %v1431_v2 = vld [vmem:[#allocation5 + $0x8] ss:$12 sps:$4 sm:$0xff]   ;;  %v608_v51 = vlaneseq  ;;  %s1283_s12 = sshll.u32 %s1727_s28, 8 }
  0x6b   : > { %1634 = vsyncadd (%p2068_p8), [#allocation6], 4294961152  ;;  %538 = vmatprep.mubr.bf16.mxu0 %v1662_v0  ;;  %506 = vmatprep.subr.bf16.mxu0 %v1429_v1  ;;  %v1432_v3 = vld [vmem:[#allocation5] ss:$12 sps:$4 sm:$0xff]   ;;  %v1433_v4 = vld [vmem:[#allocation5 + $0x1c] ss:$12 sps:$4 sm:$0xff]   ;;  %s2002_s9 = scalar_lea.hbm %s2055_s7, %s1283_s12 }
  0x6c   : > { %1315 = vmatprep.subr.bf16.mxu1 %v1431_v2  ;;  %507 = vmatpush1.bf16.msra.mxu0 %v1432_v3  ;;  %v1435_v5 = vld [vmem:[#allocation5 + $0x20] ss:$12 sps:$4 sm:$0xff]   ;;  %v1436_v6 = vld [vmem:[#allocation5 + $0x18] ss:$12 sps:$4 sm:$0xff]   ;;  %v1440_v9 = vld [vmem:[#allocation5 + $0x30] ss:$12 sps:$4 sm:$0xff]  }
  0x6d   : > { %1316 = vmatpush3.bf16.msra.mxu1 %v1431_v2  ;;  %508 = vmatprep.subr.bf16.mxu0 %v1433_v4  ;;  %v1437_v7 = vld [vmem:[#allocation5 + $0x34] ss:$12 sps:$4 sm:$0xff]   ;;  %v1439_v8 = vld [vmem:[#allocation5 + $0x38] ss:$12 sps:$4 sm:$0xff]   ;;  %v1443_v11 = vld [vmem:[#allocation5 + $0x50] ss:$12 sps:$4 sm:$0xff]  }
  0x6e   : > { %1317 = vmatprep.subr.bf16.mxu1 %v1435_v5  ;;  %v1441_v10 = vld [vmem:[#allocation5 + $0x4c] ss:$12 sps:$4 sm:$0xff]   ;;  %v1444_v12 = vld [vmem:[#allocation5 + $0x48] ss:$12 sps:$4 sm:$0xff]   ;;  %v1445_v13 = vld [vmem:[#allocation5 + $0x64] ss:$12 sps:$4 sm:$0xff]  }
  0x6f   : > { %v1447_v14 = vld [vmem:[#allocation5 + $0x68] ss:$12 sps:$4 sm:$0xff]   ;;  %v1448_v15 = vld [vmem:[#allocation5 + $0x60] ss:$12 sps:$4 sm:$0xff]   ;;  %v1452_v19 = vld [vmem:[#allocation5 + $0x78] ss:$12 sps:$4 sm:$0xff]  }
  0x70   : > { %509 = vmatpush1.bf16.msra.mxu0 %v1436_v6  ;;  %v1449_v16 = vld [vmem:[#allocation5 + $0x7c] ss:$12 sps:$4 sm:$0xff]   ;;  %v1451_v17 = vld [vmem:[#allocation5 + $0x80] ss:$12 sps:$4 sm:$0xff]   ;;  %v1455_v21 = vld [vmem:[#allocation5 + $0x98] ss:$12 sps:$4 sm:$0xff]  }
  0x71   : > { %1318 = vmatpush3.bf16.msra.mxu1 %v1435_v5  ;;  %510 = vmatprep.subr.bf16.mxu0 %v1437_v7  ;;  %v1896_v18 = vld [vmem:[%s1884_s21] sm:$0xff]   ;;  %v1457_v23 = vld [vmem:[#allocation5 + $0xac] ss:$12 sps:$4 sm:$0xff]   ;;  %v1469_v30 = vld [vmem:[#allocation7 + $0x1c] ss:$12 sps:$4 sm:$0xff]   ;;  %v1907_v52 = vshrl.u32 %v608_v51, 7 }
  0x72   : > { %1319 = vmatprep.subr.bf16.mxu1 %v1439_v8  ;;  %v1453_v20 = vld [vmem:[#allocation5 + $0x94] ss:$12 sps:$4 sm:$0xff]   ;;  %v1456_v22 = vld [vmem:[#allocation5 + $0x90] ss:$12 sps:$4 sm:$0xff]   ;;  %1331 = vmatprep.mubr.bf16.mxu1 %v1896_v18  ;;  %v1467_v31 = vld [vmem:[#allocation7 + $0x18] ss:$12 sps:$4 sm:$0xff]  }
  0x73   : > { %v1459_v24 = vld [vmem:[#allocation5 + $0xb0] ss:$12 sps:$4 sm:$0xff]   ;;  %v1460_v25 = vld [vmem:[#allocation5 + $0xa8] ss:$12 sps:$4 sm:$0xff]   ;;  %v1463_v29 = vld [vmem:[#allocation7] ss:$12 sps:$4 sm:$0xff]  }
  0x74   : > { %511 = vmatpush1.bf16.msra.mxu0 %v1440_v9  ;;  %v1900_v26 = vld [vmem:[%s1884_s21 + $0x8] sm:$0xff]   ;;  %v1465_v27 = vld [vmem:[#allocation7 + $0x4] ss:$12 sps:$4 sm:$0xff]   ;;  %v1473_v33 = vld [vmem:[#allocation7 + $0x34] ss:$12 sps:$4 sm:$0xff]   ;;  %v610_v53 = vadd.s32 8, %v1907_v52 }
  0x75   : > { %1320 = vmatpush3.bf16.msra.mxu1 %v1439_v8  ;;  %512 = vmatprep.subr.bf16.mxu0 %v1441_v10  ;;  %v1466_v28 = vld [vmem:[#allocation7 + $0x8] ss:$12 sps:$4 sm:$0xff]   ;;  %v1470_v32 = vld [vmem:[#allocation7 + $0x20] ss:$12 sps:$4 sm:$0xff]   ;;  %v1471_v34 = vld [vmem:[#allocation7 + $0x30] ss:$12 sps:$4 sm:$0xff]  }
  0x76   : > { %1321 = vmatprep.subr.bf16.mxu1 %v1443_v11  ;;  %v1474_v35 = vld [vmem:[#allocation7 + $0x38] ss:$12 sps:$4 sm:$0xff]   ;;  %v1475_v37 = vld [vmem:[#allocation7 + $0x48] ss:$12 sps:$4 sm:$0xff]   ;;  %v1478_v38 = vld [vmem:[#allocation7 + $0x50] ss:$12 sps:$4 sm:$0xff]  }
  0x77   : > { %v1477_v36 = vld [vmem:[#allocation7 + $0x4c] ss:$12 sps:$4 sm:$0xff]   ;;  %v1481_v39 = vld [vmem:[#allocation7 + $0x64] ss:$12 sps:$4 sm:$0xff]   ;;  %v1482_v41 = vld [vmem:[#allocation7 + $0x68] ss:$12 sps:$4 sm:$0xff]  }
  0x78   : > { %513 = vmatpush1.bf16.msra.mxu0 %v1444_v12  ;;  %v1479_v40 = vld [vmem:[#allocation7 + $0x60] ss:$12 sps:$4 sm:$0xff]   ;;  %v1485_v42 = vld [vmem:[#allocation7 + $0x7c] ss:$12 sps:$4 sm:$0xff]   ;;  %v1483_v43 = vld [vmem:[#allocation7 + $0x78] ss:$12 sps:$4 sm:$0xff]  }
  0x79   : > { %1322 = vmatpush3.bf16.msra.mxu1 %v1443_v11  ;;  %514 = vmatprep.subr.bf16.mxu0 %v1445_v13  ;;  %v1486_v44 = vld [vmem:[#allocation7 + $0x80] ss:$12 sps:$4 sm:$0xff]   ;;  %v1487_v46 = vld [vmem:[#allocation7 + $0x90] ss:$12 sps:$4 sm:$0xff]   ;;  %v1490_v47 = vld [vmem:[#allocation7 + $0x98] ss:$12 sps:$4 sm:$0xff]  }
  0x7a   : > { %1323 = vmatprep.subr.bf16.mxu1 %v1447_v14  ;;  %v1489_v45 = vld [vmem:[#allocation7 + $0x94] ss:$12 sps:$4 sm:$0xff]   ;;  %v1493_v48 = vld [vmem:[#allocation7 + $0xac] ss:$12 sps:$4 sm:$0xff]   ;;  %v1494_v50 = vld [vmem:[#allocation7 + $0xb0] ss:$12 sps:$4 sm:$0xff]  }
  0x7b   : > { %v1491_v49 = vld [vmem:[#allocation7 + $0xa8] ss:$12 sps:$4 sm:$0xff]   ;;  %v624_v56 = vand.u32 15, %v610_v53  ;;  %v611_v59 = vadd.s32 16, %v1907_v52  ;;  %vm669_vm0 = vcmp.lt.s32.totalorder %v1907_v52, 1  ;;  %vm694_vm1 = vcmp.lt.s32.totalorder %v1907_v52, 7 }
  0x7c   : > { %515 = vmatpush1.bf16.msra.mxu0 %v1448_v15  ;;  %v612_v8 = vadd.s32 24, %v1907_v52  ;;  %s326_s14 = scalar_lea.vmem [#allocation8], %s1208_s29  ;;  %s1092_s28 = scalar_lea.sflag [#allocation4], %s1878_s23 }
  0x7d   : > { %1324 = vmatpush3.bf16.msra.mxu1 %v1447_v14  ;;  %516 = vmatprep.subr.bf16.mxu0 %v1449_v16  ;;  %vm1913_vm2 = vcmp.ne.s32.totalorder %v624_v56, 15  ;;  %v631_v10 = vand.u32 15, %v611_v59  ;;  %s1106_s18 = sshll.u32 %s326_s14, 4  ;;  %p2077_p0 = scmp.ne.s32.totalorder %s2064_s16, 0  ;;  %s2004_s18 = int_to_ptr.vmem [resolvable:$true] %s1106_s18 }
  0x7e   : > { %1325 = vmatprep.subr.bf16.mxu1 %v1451_v17  ;;  %s1583_s20 = scalar_lea.vmem %s2004_s18, 256  ;;  %s1663_s29 = smov [#allocation8]  }
  0x7f   : > { %vm1931_vm3 = vcmp.ne.s32.totalorder %v631_v10, 0  ;;  %p1584_p11 = scmp.ne.s32.totalorder %s2004_s18, %s1583_s20  ;;  %s1587_s11 = sshll.u32 %s1663_s29, 4  ;;  %s1588_s11 = int_to_ptr.vmem [resolvable:$false] %s1587_s11 }
  0x80   : > { %517 = vmatpush1.bf16.msra.mxu0 %v1452_v19  ;;  %s1589_s22 = scalar_lea.vmem %s1588_s11, 512  ;;  %p1590_p7 = scmp.lt.s32.totalorder %s2004_s18, %s1588_s11 }
  0x81   : > { %1326 = vmatpush3.bf16.msra.mxu1 %v1451_v17  ;;  %518 = vmatprep.subr.bf16.mxu0 %v1453_v20  ;;  %v617_v17 = vand.u32 15, %v1907_v52  ;;  %v1066_v52 = vunpack.c.h.bf16 %v1900_v26  ;;  %p1585_p1 = pnand %p1584_p11, %p2077_p0  ;;  %p1591_p9 = scmp.lt.s32.totalorder %s1589_s22, %s1583_s20 }
  0x82   : > { %1327 = vmatprep.subr.bf16.mxu1 %v1455_v21 }
  0x83   : > { %vm1937_vm4 = vcmp.ne.s32.totalorder %v617_v17, 0  ;;  %p1586_p3 = pneg %p1585_p1  ;;  %p1592_p12 = por %p1591_p9, %p1590_p7 }
  0x84   : > { %519 = vmatpush1.bf16.msra.mxu0 %v1456_v22 }
  0x85   : > { %1328 = vmatpush3.bf16.msra.mxu1 %v1455_v21  ;;  %520 = vmatprep.subr.bf16.mxu0 %v1457_v23  ;;  %v638_v21 = vand.u32 15, %v612_v8  ;;  %p1593_p2 = pnand %p1592_p12, %p1586_p3 }
  0x86   : > { %1329 = vmatprep.subr.bf16.mxu1 %v1459_v24 }
  0x87   : > { %vm1946_vm5 = vcmp.ne.s32.totalorder %v638_v21, 15 }
  0x88   : > { %521 = vmatpush1.bf16.msra.mxu0 %v1460_v25 }
  0x89   : > { %1330 = vmatpush3.bf16.msra.mxu1 %v1459_v24  ;;  %907 = vmatprep.subr.bf16.mxu0 %v1465_v27 }
  0x8a   : > { %1335 = vmatprep.subr.bf16.mxu1 %v1466_v28 }
  0x8b   : > { %539 = vmatmul.mubr.bf16.vlgmr.msra.gmra.mrb[0].mxu0 %v1896_v18 }
  0x8c   : > { %1332 = vmatmul.mubr.bf16.vlgmr.msra.gmra.mrb[0].mxu1 %v1900_v26  ;;  %548 = vmatprep.mubr.bf16.mxu0 %v1662_v0 }
  0x8d   : > { %908 = vmatpush1.bf16.msra.mxu0 %v1463_v29  ;;  %1336 = vmatpush3.bf16.msra.mxu1 %v1466_v28  ;;  %v1063_v28 = vunpack.c.l.bf16 %v1896_v18 }
  0x8e   : > { %909 = vmatprep.subr.bf16.mxu0 %v1469_v30  ;;  %1337 = vmatprep.subr.bf16.mxu1 %v1470_v32 }
  0x91   : > { %910 = vmatpush1.bf16.msra.mxu0 %v1467_v31  ;;  %1338 = vmatpush3.bf16.msra.mxu1 %v1470_v32  ;;  %v1238_v32 = vld [vmem:[%s2050_s2] ss:$0 sm:$0xff] }
  0x92   : > { %911 = vmatprep.subr.bf16.mxu0 %v1473_v33  ;;  %1339 = vmatprep.subr.bf16.mxu1 %v1474_v35 }
  0x93   : > { %549 = vmatmul.mubr.bf16.gmra.mrb[4].mxu0 %v1900_v26 }
  0x94   : > { %939 = vmatprep.mubr.bf16.mxu0 %v1662_v0 }
  0x95   : > { %912 = vmatpush1.bf16.msra.mxu0 %v1471_v34  ;;  %1340 = vmatpush3.bf16.msra.mxu1 %v1474_v35 }
  0x96   : > { %913 = vmatprep.subr.bf16.mxu0 %v1477_v36  ;;  %1341 = vmatprep.subr.bf16.mxu1 %v1478_v38 }
  0x99   : > { %914 = vmatpush1.bf16.msra.mxu0 %v1475_v37  ;;  %1342 = vmatpush3.bf16.msra.mxu1 %v1478_v38 }
  0x9a   : > { %915 = vmatprep.subr.bf16.mxu0 %v1481_v39  ;;  %1343 = vmatprep.subr.bf16.mxu1 %v1482_v41 }
  0x9d   : > { %916 = vmatpush1.bf16.msra.mxu0 %v1479_v40  ;;  %1344 = vmatpush3.bf16.msra.mxu1 %v1482_v41 }
  0x9e   : > { %917 = vmatprep.subr.bf16.mxu0 %v1485_v42  ;;  %1345 = vmatprep.subr.bf16.mxu1 %v1486_v44 }
  0xa1   : > { %918 = vmatpush1.bf16.msra.mxu0 %v1483_v43  ;;  %1346 = vmatpush3.bf16.msra.mxu1 %v1486_v44  ;;  %v1239_v43 = vld [vmem:[%s2051_s3] ss:$0 sm:$0xff] }
  0xa2   : > { %919 = vmatprep.subr.bf16.mxu0 %v1489_v45  ;;  %1347 = vmatprep.subr.bf16.mxu1 %v1490_v47 }
  0xa5   : > { %920 = vmatpush1.bf16.msra.mxu0 %v1487_v46  ;;  %1348 = vmatpush3.bf16.msra.mxu1 %v1490_v47 }
  0xa6   : > { %921 = vmatprep.subr.bf16.mxu0 %v1493_v48  ;;  %1349 = vmatprep.subr.bf16.mxu1 %v1494_v50 }
  0xa9   : > { %922 = vmatpush1.bf16.msra.mxu0 %v1491_v49  ;;  %1350 = vmatpush3.bf16.msra.mxu1 %v1494_v50 }
 0x15e   : > { %v540_v54 = vpop.f32.mrb[0].mxu0 }
 0x15f   : > { %v1333_v55 = vpop.f32.mrb[0].mxu1  ;;  %v542_v57 = vpop.f32.mrb[1].mxu0  ;;  %v665_v1 = vrot.slane %v540_v54, 7 }
 0x160   : > { %v593_v58 = vpop.f32.mrb[1].mxu1  ;;  %v692_v60 = vrot.slane %v1333_v55, 1  ;;  %v544_v62 = vpop.f32.mrb[2].mxu0 }
 0x161   : > { %v690_v61 = vrot.slane %v593_v58, 1  ;;  %v1334_v63 = vpop.f32.mrb[2].mxu1  ;;  %v666_v2 = vrot.slane %v544_v62, 7  ;;  %v546_v4 = vpop.f32.mrb[3].mxu0 }
 0x162   : > { %v693_v3 = vrot.slane %v1334_v63, 1  ;;  %v596_v5 = vpop.f32.mrb[3].mxu1 }
 0x163   : > { %v691_v7 = vrot.slane %v596_v5, 1  ;;  %v672_v9 = vsel %vm669_vm0, %v665_v1, %v666_v2 }
 0x164   : > { %v695_v11 = vsel %vm694_vm1, %v692_v60, %v693_v3  ;;  %v698_v12 = vsel %vm694_vm1, %v693_v3, %v690_v61  ;;  %v712_v13 = vadd.f32 %v672_v9, %v546_v4 }
 0x165   : > { %v696_v14 = vsel %vm694_vm1, %v691_v7, %v692_v60  ;;  %v697_v15 = vsel %vm694_vm1, %v690_v61, %v691_v7  ;;  %v710_v42 = vsel %vm1946_vm5, %v698_v12, 0.0 }
 0x166   : > { %v708_v16 = vsel %vm1913_vm2, %v696_v14, 0.0  ;;  %v550_v20 = vpop.f32.mrb[4].mxu0 }
 0x167   : > { %v716_v19 = vadd.f32 %v712_v13, %v708_v16  ;;  %v667_v22 = vrot.slane %v550_v20, 7  ;;  %v552_v23 = vpop.f32.mrb[5].mxu0 }
 0x168   : > { %v554_v25 = vpop.f32.mrb[6].mxu0 }
 0x169   : > { %v671_v27 = vsel %vm669_vm0, %v666_v2, %v667_v22  ;;  %v668_v29 = vrot.slane %v554_v25, 7  ;;  %v556_v30 = vpop.f32.mrb[7].mxu0  ;;  %v727_v40 = vmul.f32 %v1238_v32, %v716_v19  ;;  %v1264_v19 = vld [vmem:[%s2053_s5] ss:$0 sm:$0xff] }
 0x16a   : > { %v684_v31 = vsel %vm1931_vm3, %v671_v27, 0.0  ;;  %v1265_v25 = vld [vmem:[%s2054_s6] ss:$0 sm:$0xff] }
 0x16b   : > { %v713_v34 = vadd.f32 %v684_v31, %v552_v23  ;;  %v673_v35 = vsel %vm669_vm0, %v668_v29, %v665_v1  ;;  %v670_v36 = vsel %vm669_vm0, %v667_v22, %v668_v29  ;;  %v738_v50 = vadd.f32 %v1239_v43, %v727_v40 }
 0x16c   : > { %v682_v37 = vsel %vm1937_vm4, %v673_v35, 0.0  ;;  %v714_v38 = vadd.f32 %v670_v36, %v556_v30  ;;  %v1064_v29 = vunpack.c.h.bf16 %v1896_v18 }
 0x16d   : > { %v717_v39 = vadd.f32 %v713_v34, %v695_v11  ;;  %v711_v41 = vadd.f32 %v682_v37, %v542_v57  ;;  %v742_v57 = vmax.f32 %v738_v50, 0.0 }
 0x16e   : > { %v718_v44 = vadd.f32 %v714_v38, %v710_v42 }
 0x16f   : > { %v728_v45 = vmul.f32 %v1238_v32, %v717_v39  ;;  %v715_v46 = vadd.f32 %v711_v41, %v697_v15 }
 0x170   : > { %v729_v47 = vmul.f32 %v1238_v32, %v718_v44 }
 0x171   : > { %v739_v48 = vadd.f32 %v1239_v43, %v728_v45  ;;  %v726_v49 = vmul.f32 %v1238_v32, %v715_v46  ;;  %v1065_v45 = vunpack.c.l.bf16 %v1900_v26 }
 0x172   : > { %v740_v51 = vadd.f32 %v1239_v43, %v729_v47 }
 0x173   : > { %v743_v53 = vmax.f32 %v739_v48, 0.0  ;;  %v737_v54 = vadd.f32 %v1239_v43, %v726_v49 }
 0x174   : > { %v744_v55 = vmax.f32 %v740_v51, 0.0 }
 0x175   : > { %v741_v56 = vmax.f32 %v737_v54, 0.0 }
 0x176   : > { %v746_v58 = vpack.c.bf16 %v744_v55, %v743_v53 }
 0x177   : > { %v745_v59 = vpack.c.bf16 %v742_v57, %v741_v56 }
 0x179   : > { %940 = vmatmul.mubr.bf16.vlgmr.msra.gmra.mrb[8].mxu0 %v745_v59  ;;  %1351 = vmatprep.mubr.bf16.mxu1 %v745_v59 }
 0x17a   : > { %1352 = vmatmul.mubr.bf16.vlgmr.msra.gmra.mrb[4].mxu1 %v746_v58  ;;  %949 = vmatprep.mubr.bf16.mxu0 %v1662_v0 }
 0x181   : > { %950 = vmatmul.mubr.bf16.gmra.mrb[12].mxu0 %v746_v58 }
 0x24c   : > { %v941_v60 = vpop.f32.mrb[8].mxu0 }
 0x24d   : > { %v943_v61 = vpop.f32.mrb[9].mxu0  ;;  %v1353_v62 = vpop.f32.mrb[4].mxu1  ;;  %v1009_v2 = vrot.slane %v941_v60, 7 }
 0x24e   : > { %v945_v63 = vpop.f32.mrb[10].mxu0  ;;  %v994_v1 = vpop.f32.mrb[5].mxu1  ;;  %v1023_v8 = vrot.slane %v1353_v62, 1 }
 0x24f   : > { %v1010_v3 = vrot.slane %v945_v63, 7  ;;  %v1021_v4 = vrot.slane %v994_v1, 1  ;;  %v947_v5 = vpop.f32.mrb[11].mxu0  ;;  %v1354_v7 = vpop.f32.mrb[6].mxu1 }
 0x250   : > { %v1024_v9 = vrot.slane %v1354_v7, 1  ;;  %v997_v10 = vpop.f32.mrb[7].mxu1 }
 0x251   : > { %v1015_v11 = vsel %vm669_vm0, %v1009_v2, %v1010_v3  ;;  %v1022_v12 = vrot.slane %v997_v10, 1 }
 0x252   : > { %v1034_v13 = vadd.f32 %v1015_v11, %v947_v5  ;;  %v1025_v0 = vsel %vm694_vm1, %v1023_v8, %v1024_v9  ;;  %v1028_v14 = vsel %vm694_vm1, %v1024_v9, %v1021_v4 }
 0x253   : > { %v1026_v15 = vsel %vm694_vm1, %v1022_v12, %v1023_v8  ;;  %v1027_v16 = vsel %vm694_vm1, %v1021_v4, %v1022_v12  ;;  %v1032_v24 = vsel %vm1946_vm5, %v1028_v14, 0.0 }
 0x254   : > { %v1030_v17 = vsel %vm1913_vm2, %v1026_v15, 0.0  ;;  %v951_v20 = vpop.f32.mrb[12].mxu0 }
 0x255   : > { %v1038_v21 = vadd.f32 %v1034_v13, %v1030_v17  ;;  %v1011_v22 = vrot.slane %v951_v20, 7  ;;  %v953_v23 = vpop.f32.mrb[13].mxu0 }
 0x256   : > { %v955_v27 = vpop.f32.mrb[14].mxu0 }
 0x257   : > { %v1049_v30 = vmul.f32 %v1264_v19, %v1038_v21  ;;  %v1014_v6 = vsel %vm669_vm0, %v1010_v3, %v1011_v22  ;;  %v1012_v31 = vrot.slane %v955_v27, 7  ;;  %v957_v32 = vpop.f32.mrb[15].mxu0 }
 0x258   : > { %v1019_v34 = vsel %vm1931_vm3, %v1014_v6, 0.0 }
 0x259   : > { %v1060_v35 = vadd.f32 %v1265_v25, %v1049_v30  ;;  %v1035_v36 = vadd.f32 %v1019_v34, %v953_v23  ;;  %v1016_v37 = vsel %vm669_vm0, %v1012_v31, %v1009_v2  ;;  %v1013_v38 = vsel %vm669_vm0, %v1011_v22, %v1012_v31 }
 0x25a   : > { %v1017_v39 = vsel %vm1937_vm4, %v1016_v37, 0.0  ;;  %v1036_v40 = vadd.f32 %v1013_v38, %v957_v32 }
 0x25b   : > { %v1068_v41 = vadd.f32 %v1064_v29, %v1060_v35  ;;  %v1039_v42 = vadd.f32 %v1035_v36, %v1025_v0  ;;  %v1033_v43 = vadd.f32 %v1017_v39, %v943_v61 }
 0x25c   : > { %v1040_v44 = vadd.f32 %v1036_v40, %v1032_v24 }
 0x25d   : > { %v1050_v46 = vmul.f32 %v1264_v19, %v1039_v42  ;;  %v1037_v47 = vadd.f32 %v1033_v43, %v1027_v16 }
 0x25e   : > { %v1051_v48 = vmul.f32 %v1264_v19, %v1040_v44 }
 0x25f   : > { %v1061_v49 = vadd.f32 %v1265_v25, %v1050_v46  ;;  %v1048_v50 = vmul.f32 %v1264_v19, %v1037_v47 }
 0x260   : > { %v1062_v51 = vadd.f32 %v1265_v25, %v1051_v48 }
 0x261   : > { %v1069_v53 = vadd.f32 %v1065_v45, %v1061_v49  ;;  %v1059_v54 = vadd.f32 %v1265_v25, %v1048_v50 }
 0x262   : > { %v1070_v33 = vadd.f32 %v1066_v52, %v1062_v51 }
 0x263   : > { %v1067_v55 = vadd.f32 %v1063_v28, %v1059_v54 }
 0x264   : > { %v1292_v56 = vpack.c.bf16 %v1070_v33, %v1069_v53 }
 0x265   : > { %v1287_v18 = vpack.c.bf16 %v1068_v41, %v1067_v55 }
 0x266   : > { %1294 = vst [vmem:[%s326_s14 + $0x8] sm:$0xff] %v1292_v56  }
 0x267   : > { %1288 = vst [vmem:[%s326_s14] sm:$0xff] %v1287_v18  }
 0x268   : > { %1596 = shalt.err (!%p1593_p2)
}
 0x269   : > { %s1597_s10 = scalar_lea.hbm %s2002_s9, 256  ;;  %s1601_s12 = scalar_lea.hbm %s2055_s7, 512 }
 0x26a   : > { %p1598_p13 = scmp.ne.s32.totalorder %s2002_s9, %s1597_s10  ;;  %p1602_p4 = scmp.lt.u32.totalorder %s2002_s9, %s2055_s7 }
 0x26b   : > { %p1603_p5 = scmp.lt.u32.totalorder %s1601_s12, %s1597_s10  ;;  %p1605_p11 = scmp.lt.u32.totalorder %s1597_s10, %s2002_s9 }
 0x26c   : > { %p1599_p6 = pnand %p1598_p13, %p2077_p0 }
 0x26d   : > { %p1604_p8 = por %p1603_p5, %p1602_p4 }
 0x26e   : > { %p1600_p10 = pneg %p1599_p6 }
 0x26f   : > { %p1606_p1 = por %p1605_p11, %p1604_p8 }
 0x271   : > { %p1607_p3 = pnand %p1606_p1, %p1600_p10 }
 0x273   : > { %1610 = shalt.err (!%p1607_p3)
}
 0x274   : > { %s1664_s30 = smov 64   ;;  %s1665_s20 = smov 4  }
 0x275   : > { %1365 = dma.vmem_to_hbm [thread:$0]  (%p2077_p0), %s2004_s18, 256, %s2002_s9, %s1092_s28, %s1664_s30, %s1664_s30, %s1665_s20  }
 0x276 PF: > { %s1121_s29 = sand.u32 1, %s1641_s24   ;;  %p2078_p7 = scmp.ne.s32.totalorder %s2060_s8, 0 }
 0x277   : > { %p2079_p9 = scmp.ge.s32.totalorder %s1653_s27, 2  ;;  %s1122_s11 = scalar_lea.sflag [#allocation4], %s1121_s29 }
 0x279   : > { %p1379_p12 = pnand %p2079_p9, %p2078_p7 }
 0x27b   : > { %1636 = dma.done.wait (!%p1379_p12), %s1122_s11, 256  }
 0x27c   : > { %1638 = vsyncadd (!%p1379_p12), %s1122_s11, 4294967040  ;;  %p21_p2 = scmp.ge.s32.totalorder %s1816_s13, 4   ;;  %s2080_s24 = smov %s1645_s25 }
 0x27d   : > { %s2081_s25 = smov %s1649_s26  ;;  %s2082_s26 = smov %s1832_s17 }
 0x27e   : > { %s2083_s27 = smov %s1816_s13  ;;  %23 = sbr.rel (!%p21_p2) target bundleno = 6 (0x6), region = 101 }
 0x285   :  { %1127 = vsyncpa [#allocation3], 1 }
 0x286   :  { %1129 = vsyncpa [#allocation3 + $0x1], 1 }
 0x287   :  { %1130 = vsyncpa [#allocation6], 1 }
 0x288   :  { %1131 = vsyncpa [#allocation4], 1 }
 0x289   :  { %1133 = vsyncpa [#allocation4 + $0x1], 1 }

// kernel: tpu_custom_call.1
= control target key start
LH: loop header
LB: loop body
LE: loop exit
PB: predicated region body
PF: predicated region fallthrough
CT: control target
= control target key end

     0   :  { %12 = vsyncpa [#allocation3], 0  ;;  %s2048_s0 = inlined_call_operand.hbm [shape: bf16[4,16,128], index: 0, kind: input, shape index: {}]   ;;  %s2049_s1 = inlined_call_operand.hbm [shape: bf16[128,384], index: 1, kind: input, shape index: {}]   ;;  %s2050_s2 = inlined_call_operand.vmem [shape: f32[1,128], index: 2, kind: input, shape index: {}]   ;;  %s2051_s3 = inlined_call_operand.vmem [shape: f32[1,128], index: 3, kind: input, shape index: {}]   ;;  %s2052_s4 = inlined_call_operand.hbm [shape: bf16[128,384], index: 4, kind: input, shape index: {}]   ;;  %s2053_s5 = inlined_call_operand.vmem [shape: f32[1,128], index: 5, kind: input, shape index: {}]   ;;  %s2054_s6 = inlined_call_operand.vmem [shape: f32[1,128], index: 6, kind: input, shape index: {}]   ;;  %s2055_s7 = inlined_call_operand.hbm [shape: bf16[4,16,128], index: 7, kind: output, shape index: {}]  }
   0x1   :  { %14 = vsyncpa [#allocation3 + $0x1], 0 }
   0x2   :  { %15 = vsyncpa [#allocation6], 0 }
   0x3   :  { %16 = vsyncpa [#allocation4], 0 }
   0x4   :  { %18 = vsyncpa [#allocation4 + $0x1], 0  ;;  %s1706_s24 = smov 0   ;;  %s1708_s25 = smov 0  }
   0x5   :  { %s1710_s26 = smov 0   ;;  %s1712_s27 = smov 0  }
   0x6 LB: > { %s1727_s28 = sadd.s32 4294967295, %s1653_s27   ;;  %s1198_s29 = sadd.s32 4294967294, %s1653_s27   ;;  %s1653_s27 = sphi %s1712_s27, %s2083_s27   ;;  %s1649_s26 = sphi %s1710_s26, %s2082_s26   ;;  %s1645_s25 = sphi %s1708_s25, %s2081_s25   ;;  %s1641_s24 = sphi %s1706_s24, %s2080_s24  }
   0x7   : > { %p44_p0 = scmp.ne.s32.totalorder %s1645_s25, %s1641_s24  ;;  %p2056_p1 = scmp.eq.s32.totalorder %s1727_s28, 0 }
   0x8   : > { %p200_p3 = scmp.eq.s32.totalorder %s1198_s29, 1  ;;  %p1199_p5 = scmp.ge.s32.totalorder %s1653_s27, 1 }
   0x9   : > { %p1736_p4 = por %p2056_p1, %p44_p0  ;;  %p207_p7 = scmp.lt.s32.totalorder %s1653_s27, 3 }
   0xa   : > { %p1741_p6 = por %p200_p3, %p44_p0  ;;  %s1655_s10 = smov [#allocation5]  }
   0xb   : > { %s2059_s30 = scalar_select %p1736_p4, 1, 0 }
   0xc   : > { %s2060_s8 = scalar_select %p1741_p6, 1, 0 }
   0xd   : > { %p1746_p8 = pnand %p1199_p5, %p207_p7  ;;  %s219_s11 = sshll.u32 %s1655_s10, 4  ;;  %s1750_s11 = int_to_ptr.vmem [resolvable:$true] %s219_s11 }
   0xe   : > { %s1656_s13 = smov [#allocation7]   ;;  %s1497_s17 = scalar_lea.hbm %s2049_s1, 3072 }
   0xf   : > { %p1367_p9 = pneg %p1746_p8  ;;  %s238_s14 = sshll.u32 %s1656_s13, 4  ;;  %s1761_s14 = int_to_ptr.vmem [resolvable:$true] %s238_s14 }
  0x10   : > { %p1498_p12 = scmp.ne.s32.totalorder %s2049_s1, %s1497_s17  ;;  %p1504_p5 = scmp.lt.u32.totalorder %s1497_s17, %s2049_s1 }
  0x11   : > { %p1757_p11 = pnand %p1367_p9, %p2056_p1 }
  0x13   : > { %p1499_p13 = pneg %p1757_p11 }
  0x15   : > { %p1500_p0 = pnand %p1499_p13, %p1498_p12 }
  0x17   : > { %p1501_p3 = pneg %p1500_p0 }
  0x19   : > { %p1506_p7 = pnand %p1504_p5, %p1501_p3 }
  0x1b   : > { %1509 = shalt.err (!%p1506_p7)
}
  0x1c   : > { %s1510_s22 = scalar_lea.vmem %s1750_s11, 3072  ;;  %p1518_p2 = scmp.lt.s32.totalorder %s1750_s11, %s1750_s11 }
  0x1d   : > { %p1511_p9 = scmp.ne.s32.totalorder %s1750_s11, %s1510_s22  ;;  %p1519_p12 = scmp.lt.s32.totalorder %s1510_s22, %s1510_s22 }
  0x1f   : > { %p1513_p10 = pnand %p1511_p9, %p1499_p13  ;;  %p1520_p0 = por %p1519_p12, %p1518_p2 }
  0x21   : > { %p1514_p1 = pneg %p1513_p10 }
  0x23   : > { %p1521_p6 = pnand %p1520_p0, %p1514_p1 }
  0x25   : > { %1524 = shalt.err (!%p1521_p6)
}
  0x26   : > { %s1657_s23 = smov 192   ;;  %s1658_s29 = smov 12  }
  0x27   : > { %1370 = dma.hbm_to_vmem [thread:$0]  (!%p1757_p11), %s2049_s1, 3072, %s1750_s11, [#allocation6], %s1657_s23, %s1657_s23, %s1658_s29  }
  0x28   : > { %s1525_s17 = scalar_lea.hbm %s2052_s4, 3072 }
  0x29   : > { %p1526_p2 = scmp.ne.s32.totalorder %s2052_s4, %s1525_s17  ;;  %p1532_p10 = scmp.lt.u32.totalorder %s1525_s17, %s2052_s4 }
  0x2b   : > { %p1528_p1 = pnand %p1526_p2, %p1499_p13 }
  0x2d   : > { %p1529_p6 = pneg %p1528_p1 }
  0x2f   : > { %p1534_p3 = pnand %p1532_p10, %p1529_p6 }
  0x31   : > { %1537 = shalt.err (!%p1534_p3)
}
  0x32   : > { %s1538_s11 = scalar_lea.vmem %s1761_s14, 3072  ;;  %p1546_p12 = scmp.lt.s32.totalorder %s1761_s14, %s1761_s14 }
  0x33   : > { %p1539_p5 = scmp.ne.s32.totalorder %s1761_s14, %s1538_s11  ;;  %p1547_p0 = scmp.lt.s32.totalorder %s1538_s11, %s1538_s11 }
  0x35   : > { %p1541_p7 = pnand %p1539_p5, %p1499_p13  ;;  %p1548_p2 = por %p1547_p0, %p1546_p12 }
  0x37   : > { %p1542_p9 = pneg %p1541_p7 }
  0x39   : > { %p1549_p1 = pnand %p1548_p2, %p1542_p9 }
  0x3b   : > { %1552 = shalt.err (!%p1549_p1)
}
  0x3c   : > { %1373 = dma.hbm_to_vmem [thread:$0]  (!%p1757_p11), %s2052_s4, 3072, %s1761_s14, [#allocation6], %s1657_s23, %s1657_s23, %s1658_s29  }
  0x3d   : > { %s1816_s13 = sadd.s32 1, %s1653_s27   ;;  %s31_s12 = sadd.s32 1, %s1649_s26 }
  0x3e   : > { %s28_s15 = ssub.s32 %s1653_s27, %s1816_s13  ;;  %p38_p13 = scmp.ne.s32.totalorder %s1649_s26, %s1645_s25 }
  0x3f   : > { %p29_p6 = scmp.eq.s32.totalorder %s28_s15, 0  ;;  %p39_p10 = scmp.eq.s32.totalorder %s1653_s27, 0 }
  0x40   : > { %p2063_p3 = scmp.eq.s32.totalorder %s1727_s28, 1  ;;  %p1384_p7 = scmp.lt.s32.totalorder %s1653_s27, 2 }
  0x41   : > { %s1832_s17 = scalar_select %p29_p6, %s1649_s26, %s31_s12  }
  0x42   : > { %p1826_p5 = por %p2063_p3, %p38_p13  ;;  %p40_p9 = por %p39_p10, %p38_p13 }
  0x43   : > { %s258_s18 = sand.u32 1, %s1649_s26   ;;  %s1277_s14 = sshll.u32 %s1653_s27, 8 }
  0x44   : > { %s2064_s16 = scalar_select %p1826_p5, 1, 0 }
  0x45   : > { %s1203_s19 = sshll.u32 %s258_s18, 4  ;;  %s1839_s20 = scalar_lea.hbm %s2048_s0, %s1277_s14 }
  0x46   : > { %s262_s21 = scalar_lea.vmem [#allocation2], %s1203_s19  ;;  %p1843_p11 = pnand %p1384_p7, %p40_p9 }
  0x47   : > { %s270_s11 = sshll.u32 %s262_s21, 4  ;;  %s1847_s10 = scalar_lea.sflag [#allocation3], %s258_s18  ;;  %s1841_s11 = int_to_ptr.vmem [resolvable:$true] %s270_s11 }
  0x48   : > { %s1553_s12 = scalar_lea.hbm %s1839_s20, 256  ;;  %p1555_p0 = pneg %p1843_p11 }
  0x49   : > { %p1554_p12 = scmp.ne.s32.totalorder %s1839_s20, %s1553_s12  ;;  %s1558_s14 = scalar_lea.hbm %s2048_s0, 512 }
  0x4a   : > { %p1559_p13 = scmp.lt.u32.totalorder %s1839_s20, %s2048_s0  ;;  %p1560_p6 = scmp.lt.u32.totalorder %s1558_s14, %s1553_s12 }
  0x4b   : > { %p1556_p2 = pnand %p1555_p0, %p1554_p12  ;;  %p1562_p3 = scmp.lt.u32.totalorder %s1553_s12, %s1839_s20 }
  0x4c   : > { %p1561_p10 = por %p1560_p6, %p1559_p13 }
  0x4d   : > { %p1557_p1 = pneg %p1556_p2 }
  0x4e   : > { %p1563_p7 = por %p1562_p3, %p1561_p10 }
  0x50   : > { %p1564_p9 = pnand %p1563_p7, %p1557_p1 }
  0x52   : > { %1567 = shalt.err (!%p1564_p9)
}
  0x53   : > { %s1568_s18 = scalar_lea.vmem %s1841_s11, 256  ;;  %s1659_s21 = smov [#allocation2]  }
  0x54   : > { %p1569_p12 = scmp.ne.s32.totalorder %s1841_s11, %s1568_s18  ;;  %s1573_s15 = sshll.u32 %s1659_s21, 4  ;;  %s1574_s15 = int_to_ptr.vmem [resolvable:$false] %s1573_s15 }
  0x55   : > { %s1575_s19 = scalar_lea.vmem %s1574_s15, 512  ;;  %p1576_p4 = scmp.lt.s32.totalorder %s1841_s11, %s1574_s15 }
  0x56   : > { %p1571_p2 = pnand %p1569_p12, %p1555_p0  ;;  %p1577_p13 = scmp.lt.s32.totalorder %s1575_s19, %s1568_s18 }
  0x58   : > { %p1572_p5 = pneg %p1571_p2  ;;  %p1578_p6 = por %p1577_p13, %p1576_p4 }
  0x5a   : > { %p1579_p10 = pnand %p1578_p6, %p1572_p5 }
  0x5c   : > { %1582 = shalt.err (!%p1579_p10)
}
  0x5d   : > { %s1660_s12 = smov 64   ;;  %s1661_s14 = smov 4  }
  0x5e   : > { %1377 = dma.hbm_to_vmem [thread:$0]  (!%p1843_p11), %s1839_s20, 256, %s1841_s11, %s1847_s10, %s1660_s12, %s1660_s12, %s1661_s14  }
  0x5f   : > { %282 = sbr.rel (%p1746_p8) target bundleno = 630 (0x276), region = 48  ;;  %s1878_s23 = sand.u32 (!%p1746_p8), 1, %s1645_s25  }
  0x60   : > { %s1208_s29 = sshll.u32 (!%p1746_p8), %s1878_s23, 4  ;;  %s285_s18 = scalar_lea.sflag (!%p1746_p8), [#allocation3], %s1878_s23 }
  0x61   : > { %s1884_s21 = scalar_lea.vmem (!%p1746_p8), [#allocation2], %s1208_s29  ;;  %p2066_p4 = scmp.ne.s32.totalorder (!%p1746_p8), %s2059_s30, 0 }
  0x66   : > { %1628 = dma.done.wait (%p2066_p4), %s285_s18, 256  }
  0x67   : > { %1630 = vsyncadd (%p2066_p4), %s285_s18, 4294967040  ;;  %p2067_p5 = scmp.eq.s32.totalorder %s1727_s28, 0 }
  0x69   : > { %1632 = dma.done.wait (%p2067_p5), [#allocation6], 6144   ;;  %p2068_p8 = pmov %p2067_p5 }
  0x6a   : > { %v1662_v0 = vmov 0   ;;  %v1429_v1 = vld [vmem:[#allocation5 + $0x4] ss:$12 sps:$4 sm:$0xff]   ;;  %v1431_v2 = vld [vmem:[#allocation5 + $0x8] ss:$12 sps:$4 sm:$0xff]   ;;  %v608_v51 = vlaneseq  ;;  %s1283_s12 = sshll.u32 %s1727_s28, 8 }
  0x6b   : > { %1634 = vsyncadd (%p2068_p8), [#allocation6], 4294961152  ;;  %538 = vmatprep.mubr.bf16.mxu0 %v1662_v0  ;;  %506 = vmatprep.subr.bf16.mxu0 %v1429_v1  ;;  %v1432_v3 = vld [vmem:[#allocation5] ss:$12 sps:$4 sm:$0xff]   ;;  %v1433_v4 = vld [vmem:[#allocation5 + $0x1c] ss:$12 sps:$4 sm:$0xff]   ;;  %s2002_s9 = scalar_lea.hbm %s2055_s7, %s1283_s12 }
  0x6c   : > { %1315 = vmatprep.subr.bf16.mxu1 %v1431_v2  ;;  %507 = vmatpush1.bf16.msra.mxu0 %v1432_v3  ;;  %v1435_v5 = vld [vmem:[#allocation5 + $0x20] ss:$12 sps:$4 sm:$0xff]   ;;  %v1436_v6 = vld [vmem:[#allocation5 + $0x18] ss:$12 sps:$4 sm:$0xff]   ;;  %v1440_v9 = vld [vmem:[#allocation5 + $0x30] ss:$12 sps:$4 sm:$0xff]  }
  0x6d   : > { %1316 = vmatpush3.bf16.msra.mxu1 %v1431_v2  ;;  %508 = vmatprep.subr.bf16.mxu0 %v1433_v4  ;;  %v1437_v7 = vld [vmem:[#allocation5 + $0x34] ss:$12 sps:$4 sm:$0xff]   ;;  %v1439_v8 = vld [vmem:[#allocation5 + $0x38] ss:$12 sps:$4 sm:$0xff]   ;;  %v1443_v11 = vld [vmem:[#allocation5 + $0x50] ss:$12 sps:$4 sm:$0xff]  }
  0x6e   : > { %1317 = vmatprep.subr.bf16.mxu1 %v1435_v5  ;;  %v1441_v10 = vld [vmem:[#allocation5 + $0x4c] ss:$12 sps:$4 sm:$0xff]   ;;  %v1444_v12 = vld [vmem:[#allocation5 + $0x48] ss:$12 sps:$4 sm:$0xff]   ;;  %v1445_v13 = vld [vmem:[#allocation5 + $0x64] ss:$12 sps:$4 sm:$0xff]  }
  0x6f   : > { %v1447_v14 = vld [vmem:[#allocation5 + $0x68] ss:$12 sps:$4 sm:$0xff]   ;;  %v1448_v15 = vld [vmem:[#allocation5 + $0x60] ss:$12 sps:$4 sm:$0xff]   ;;  %v1452_v19 = vld [vmem:[#allocation5 + $0x78] ss:$12 sps:$4 sm:$0xff]  }
  0x70   : > { %509 = vmatpush1.bf16.msra.mxu0 %v1436_v6  ;;  %v1449_v16 = vld [vmem:[#allocation5 + $0x7c] ss:$12 sps:$4 sm:$0xff]   ;;  %v1451_v17 = vld [vmem:[#allocation5 + $0x80] ss:$12 sps:$4 sm:$0xff]   ;;  %v1455_v21 = vld [vmem:[#allocation5 + $0x98] ss:$12 sps:$4 sm:$0xff]  }
  0x71   : > { %1318 = vmatpush3.bf16.msra.mxu1 %v1435_v5  ;;  %510 = vmatprep.subr.bf16.mxu0 %v1437_v7  ;;  %v1896_v18 = vld [vmem:[%s1884_s21] sm:$0xff]   ;;  %v1457_v23 = vld [vmem:[#allocation5 + $0xac] ss:$12 sps:$4 sm:$0xff]   ;;  %v1469_v30 = vld [vmem:[#allocation7 + $0x1c] ss:$12 sps:$4 sm:$0xff]   ;;  %v1907_v52 = vshrl.u32 %v608_v51, 7 }
  0x72   : > { %1319 = vmatprep.subr.bf16.mxu1 %v1439_v8  ;;  %v1453_v20 = vld [vmem:[#allocation5 + $0x94] ss:$12 sps:$4 sm:$0xff]   ;;  %v1456_v22 = vld [vmem:[#allocation5 + $0x90] ss:$12 sps:$4 sm:$0xff]   ;;  %1331 = vmatprep.mubr.bf16.mxu1 %v1896_v18  ;;  %v1467_v31 = vld [vmem:[#allocation7 + $0x18] ss:$12 sps:$4 sm:$0xff]  }
  0x73   : > { %v1459_v24 = vld [vmem:[#allocation5 + $0xb0] ss:$12 sps:$4 sm:$0xff]   ;;  %v1460_v25 = vld [vmem:[#allocation5 + $0xa8] ss:$12 sps:$4 sm:$0xff]   ;;  %v1463_v29 = vld [vmem:[#allocation7] ss:$12 sps:$4 sm:$0xff]  }
  0x74   : > { %511 = vmatpush1.bf16.msra.mxu0 %v1440_v9  ;;  %v1900_v26 = vld [vmem:[%s1884_s21 + $0x8] sm:$0xff]   ;;  %v1465_v27 = vld [vmem:[#allocation7 + $0x4] ss:$12 sps:$4 sm:$0xff]   ;;  %v1473_v33 = vld [vmem:[#allocation7 + $0x34] ss:$12 sps:$4 sm:$0xff]   ;;  %v610_v53 = vadd.s32 8, %v1907_v52 }
  0x75   : > { %1320 = vmatpush3.bf16.msra.mxu1 %v1439_v8  ;;  %512 = vmatprep.subr.bf16.mxu0 %v1441_v10  ;;  %v1466_v28 = vld [vmem:[#allocation7 + $0x8] ss:$12 sps:$4 sm:$0xff]   ;;  %v1470_v32 = vld [vmem:[#allocation7 + $0x20] ss:$12 sps:$4 sm:$0xff]   ;;  %v1471_v34 = vld [vmem:[#allocation7 + $0x30] ss:$12 sps:$4 sm:$0xff]  }
  0x76   : > { %1321 = vmatprep.subr.bf16.mxu1 %v1443_v11  ;;  %v1474_v35 = vld [vmem:[#allocation7 + $0x38] ss:$12 sps:$4 sm:$0xff]   ;;  %v1475_v37 = vld [vmem:[#allocation7 + $0x48] ss:$12 sps:$4 sm:$0xff]   ;;  %v1478_v38 = vld [vmem:[#allocation7 + $0x50] ss:$12 sps:$4 sm:$0xff]  }
  0x77   : > { %v1477_v36 = vld [vmem:[#allocation7 + $0x4c] ss:$12 sps:$4 sm:$0xff]   ;;  %v1481_v39 = vld [vmem:[#allocation7 + $0x64] ss:$12 sps:$4 sm:$0xff]   ;;  %v1482_v41 = vld [vmem:[#allocation7 + $0x68] ss:$12 sps:$4 sm:$0xff]  }
  0x78   : > { %513 = vmatpush1.bf16.msra.mxu0 %v1444_v12  ;;  %v1479_v40 = vld [vmem:[#allocation7 + $0x60] ss:$12 sps:$4 sm:$0xff]   ;;  %v1485_v42 = vld [vmem:[#allocation7 + $0x7c] ss:$12 sps:$4 sm:$0xff]   ;;  %v1483_v43 = vld [vmem:[#allocation7 + $0x78] ss:$12 sps:$4 sm:$0xff]  }
  0x79   : > { %1322 = vmatpush3.bf16.msra.mxu1 %v1443_v11  ;;  %514 = vmatprep.subr.bf16.mxu0 %v1445_v13  ;;  %v1486_v44 = vld [vmem:[#allocation7 + $0x80] ss:$12 sps:$4 sm:$0xff]   ;;  %v1487_v46 = vld [vmem:[#allocation7 + $0x90] ss:$12 sps:$4 sm:$0xff]   ;;  %v1490_v47 = vld [vmem:[#allocation7 + $0x98] ss:$12 sps:$4 sm:$0xff]  }
  0x7a   : > { %1323 = vmatprep.subr.bf16.mxu1 %v1447_v14  ;;  %v1489_v45 = vld [vmem:[#allocation7 + $0x94] ss:$12 sps:$4 sm:$0xff]   ;;  %v1493_v48 = vld [vmem:[#allocation7 + $0xac] ss:$12 sps:$4 sm:$0xff]   ;;  %v1494_v50 = vld [vmem:[#allocation7 + $0xb0] ss:$12 sps:$4 sm:$0xff]  }
  0x7b   : > { %v1491_v49 = vld [vmem:[#allocation7 + $0xa8] ss:$12 sps:$4 sm:$0xff]   ;;  %v624_v56 = vand.u32 15, %v610_v53  ;;  %v611_v59 = vadd.s32 16, %v1907_v52  ;;  %vm669_vm0 = vcmp.lt.s32.totalorder %v1907_v52, 1  ;;  %vm694_vm1 = vcmp.lt.s32.totalorder %v1907_v52, 7 }
  0x7c   : > { %515 = vmatpush1.bf16.msra.mxu0 %v1448_v15  ;;  %v612_v8 = vadd.s32 24, %v1907_v52  ;;  %s326_s14 = scalar_lea.vmem [#allocation8], %s1208_s29  ;;  %s1092_s28 = scalar_lea.sflag [#allocation4], %s1878_s23 }
  0x7d   : > { %1324 = vmatpush3.bf16.msra.mxu1 %v1447_v14  ;;  %516 = vmatprep.subr.bf16.mxu0 %v1449_v16  ;;  %vm1913_vm2 = vcmp.ne.s32.totalorder %v624_v56, 15  ;;  %v631_v10 = vand.u32 15, %v611_v59  ;;  %s1106_s18 = sshll.u32 %s326_s14, 4  ;;  %p2077_p0 = scmp.ne.s32.totalorder %s2064_s16, 0  ;;  %s2004_s18 = int_to_ptr.vmem [resolvable:$true] %s1106_s18 }
  0x7e   : > { %1325 = vmatprep.subr.bf16.mxu1 %v1451_v17  ;;  %s1583_s20 = scalar_lea.vmem %s2004_s18, 256  ;;  %s1663_s29 = smov [#allocation8]  }
  0x7f   : > { %vm1931_vm3 = vcmp.ne.s32.totalorder %v631_v10, 0  ;;  %p1584_p11 = scmp.ne.s32.totalorder %s2004_s18, %s1583_s20  ;;  %s1587_s11 = sshll.u32 %s1663_s29, 4  ;;  %s1588_s11 = int_to_ptr.vmem [resolvable:$false] %s1587_s11 }
  0x80   : > { %517 = vmatpush1.bf16.msra.mxu0 %v1452_v19  ;;  %s1589_s22 = scalar_lea.vmem %s1588_s11, 512  ;;  %p1590_p7 = scmp.lt.s32.totalorder %s2004_s18, %s1588_s11 }
  0x81   : > { %1326 = vmatpush3.bf16.msra.mxu1 %v1451_v17  ;;  %518 = vmatprep.subr.bf16.mxu0 %v1453_v20  ;;  %v617_v17 = vand.u32 15, %v1907_v52  ;;  %v1066_v52 = vunpack.c.h.bf16 %v1900_v26  ;;  %p1585_p1 = pnand %p1584_p11, %p2077_p0  ;;  %p1591_p9 = scmp.lt.s32.totalorder %s1589_s22, %s1583_s20 }
  0x82   : > { %1327 = vmatprep.subr.bf16.mxu1 %v1455_v21 }
  0x83   : > { %vm1937_vm4 = vcmp.ne.s32.totalorder %v617_v17, 0  ;;  %p1586_p3 = pneg %p1585_p1  ;;  %p1592_p12 = por %p1591_p9, %p1590_p7 }
  0x84   : > { %519 = vmatpush1.bf16.msra.mxu0 %v1456_v22 }
  0x85   : > { %1328 = vmatpush3.bf16.msra.mxu1 %v1455_v21  ;;  %520 = vmatprep.subr.bf16.mxu0 %v1457_v23  ;;  %v638_v21 = vand.u32 15, %v612_v8  ;;  %p1593_p2 = pnand %p1592_p12, %p1586_p3 }
  0x86   : > { %1329 = vmatprep.subr.bf16.mxu1 %v1459_v24 }
  0x87   : > { %vm1946_vm5 = vcmp.ne.s32.totalorder %v638_v21, 15 }
  0x88   : > { %521 = vmatpush1.bf16.msra.mxu0 %v1460_v25 }
  0x89   : > { %1330 = vmatpush3.bf16.msra.mxu1 %v1459_v24  ;;  %907 = vmatprep.subr.bf16.mxu0 %v1465_v27 }
  0x8a   : > { %1335 = vmatprep.subr.bf16.mxu1 %v1466_v28 }
  0x8b   : > { %539 = vmatmul.mubr.bf16.vlgmr.msra.gmra.mrb[0].mxu0 %v1896_v18 }
  0x8c   : > { %1332 = vmatmul.mubr.bf16.vlgmr.msra.gmra.mrb[0].mxu1 %v1900_v26  ;;  %548 = vmatprep.mubr.bf16.mxu0 %v1662_v0 }
  0x8d   : > { %908 = vmatpush1.bf16.msra.mxu0 %v1463_v29  ;;  %1336 = vmatpush3.bf16.msra.mxu1 %v1466_v28  ;;  %v1063_v28 = vunpack.c.l.bf16 %v1896_v18 }
  0x8e   : > { %909 = vmatprep.subr.bf16.mxu0 %v1469_v30  ;;  %1337 = vmatprep.subr.bf16.mxu1 %v1470_v32 }
  0x91   : > { %910 = vmatpush1.bf16.msra.mxu0 %v1467_v31  ;;  %1338 = vmatpush3.bf16.msra.mxu1 %v1470_v32  ;;  %v1238_v32 = vld [vmem:[%s2050_s2] ss:$0 sm:$0xff] }
  0x92   : > { %911 = vmatprep.subr.bf16.mxu0 %v1473_v33  ;;  %1339 = vmatprep.subr.bf16.mxu1 %v1474_v35 }
  0x93   : > { %549 = vmatmul.mubr.bf16.gmra.mrb[4].mxu0 %v1900_v26 }
  0x94   : > { %939 = vmatprep.mubr.bf16.mxu0 %v1662_v0 }
  0x95   : > { %912 = vmatpush1.bf16.msra.mxu0 %v1471_v34  ;;  %1340 = vmatpush3.bf16.msra.mxu1 %v1474_v35 }
  0x96   : > { %913 = vmatprep.subr.bf16.mxu0 %v1477_v36  ;;  %1341 = vmatprep.subr.bf16.mxu1 %v1478_v38 }
  0x99   : > { %914 = vmatpush1.bf16.msra.mxu0 %v1475_v37  ;;  %1342 = vmatpush3.bf16.msra.mxu1 %v1478_v38 }
  0x9a   : > { %915 = vmatprep.subr.bf16.mxu0 %v1481_v39  ;;  %1343 = vmatprep.subr.bf16.mxu1 %v1482_v41 }
  0x9d   : > { %916 = vmatpush1.bf16.msra.mxu0 %v1479_v40  ;;  %1344 = vmatpush3.bf16.msra.mxu1 %v1482_v41 }
  0x9e   : > { %917 = vmatprep.subr.bf16.mxu0 %v1485_v42  ;;  %1345 = vmatprep.subr.bf16.mxu1 %v1486_v44 }
  0xa1   : > { %918 = vmatpush1.bf16.msra.mxu0 %v1483_v43  ;;  %1346 = vmatpush3.bf16.msra.mxu1 %v1486_v44  ;;  %v1239_v43 = vld [vmem:[%s2051_s3] ss:$0 sm:$0xff] }
  0xa2   : > { %919 = vmatprep.subr.bf16.mxu0 %v1489_v45  ;;  %1347 = vmatprep.subr.bf16.mxu1 %v1490_v47 }
  0xa5   : > { %920 = vmatpush1.bf16.msra.mxu0 %v1487_v46  ;;  %1348 = vmatpush3.bf16.msra.mxu1 %v1490_v47 }
  0xa6   : > { %921 = vmatprep.subr.bf16.mxu0 %v1493_v48  ;;  %1349 = vmatprep.subr.bf16.mxu1 %v1494_v50 }
  0xa9   : > { %922 = vmatpush1.bf16.msra.mxu0 %v1491_v49  ;;  %1350 = vmatpush3.bf16.msra.mxu1 %v1494_v50 }
 0x15e   : > { %v540_v54 = vpop.f32.mrb[0].mxu0 }
 0x15f   : > { %v1333_v55 = vpop.f32.mrb[0].mxu1  ;;  %v542_v57 = vpop.f32.mrb[1].mxu0  ;;  %v665_v1 = vrot.slane %v540_v54, 7 }
 0x160   : > { %v593_v58 = vpop.f32.mrb[1].mxu1  ;;  %v692_v60 = vrot.slane %v1333_v55, 1  ;;  %v544_v62 = vpop.f32.mrb[2].mxu0 }
 0x161   : > { %v690_v61 = vrot.slane %v593_v58, 1  ;;  %v1334_v63 = vpop.f32.mrb[2].mxu1  ;;  %v666_v2 = vrot.slane %v544_v62, 7  ;;  %v546_v4 = vpop.f32.mrb[3].mxu0 }
 0x162   : > { %v693_v3 = vrot.slane %v1334_v63, 1  ;;  %v596_v5 = vpop.f32.mrb[3].mxu1 }
 0x163   : > { %v691_v7 = vrot.slane %v596_v5, 1  ;;  %v672_v9 = vsel %vm669_vm0, %v665_v1, %v666_v2 }
 0x164   : > { %v695_v11 = vsel %vm694_vm1, %v692_v60, %v693_v3  ;;  %v698_v12 = vsel %vm694_vm1, %v693_v3, %v690_v61  ;;  %v712_v13 = vadd.f32 %v672_v9, %v546_v4 }
 0x165   : > { %v696_v14 = vsel %vm694_vm1, %v691_v7, %v692_v60  ;;  %v697_v15 = vsel %vm694_vm1, %v690_v61, %v691_v7  ;;  %v710_v42 = vsel %vm1946_vm5, %v698_v12, 0.0 }
 0x166   : > { %v708_v16 = vsel %vm1913_vm2, %v696_v14, 0.0  ;;  %v550_v20 = vpop.f32.mrb[4].mxu0 }
 0x167   : > { %v716_v19 = vadd.f32 %v712_v13, %v708_v16  ;;  %v667_v22 = vrot.slane %v550_v20, 7  ;;  %v552_v23 = vpop.f32.mrb[5].mxu0 }
 0x168   : > { %v554_v25 = vpop.f32.mrb[6].mxu0 }
 0x169   : > { %v671_v27 = vsel %vm669_vm0, %v666_v2, %v667_v22  ;;  %v668_v29 = vrot.slane %v554_v25, 7  ;;  %v556_v30 = vpop.f32.mrb[7].mxu0  ;;  %v727_v40 = vmul.f32 %v1238_v32, %v716_v19  ;;  %v1264_v19 = vld [vmem:[%s2053_s5] ss:$0 sm:$0xff] }
 0x16a   : > { %v684_v31 = vsel %vm1931_vm3, %v671_v27, 0.0  ;;  %v1265_v25 = vld [vmem:[%s2054_s6] ss:$0 sm:$0xff] }
 0x16b   : > { %v713_v34 = vadd.f32 %v684_v31, %v552_v23  ;;  %v673_v35 = vsel %vm669_vm0, %v668_v29, %v665_v1  ;;  %v670_v36 = vsel %vm669_vm0, %v667_v22, %v668_v29  ;;  %v738_v50 = vadd.f32 %v1239_v43, %v727_v40 }
 0x16c   : > { %v682_v37 = vsel %vm1937_vm4, %v673_v35, 0.0  ;;  %v714_v38 = vadd.f32 %v670_v36, %v556_v30  ;;  %v1064_v29 = vunpack.c.h.bf16 %v1896_v18 }
 0x16d   : > { %v717_v39 = vadd.f32 %v713_v34, %v695_v11  ;;  %v711_v41 = vadd.f32 %v682_v37, %v542_v57  ;;  %v742_v57 = vmax.f32 %v738_v50, 0.0 }
 0x16e   : > { %v718_v44 = vadd.f32 %v714_v38, %v710_v42 }
 0x16f   : > { %v728_v45 = vmul.f32 %v1238_v32, %v717_v39  ;;  %v715_v46 = vadd.f32 %v711_v41, %v697_v15 }
 0x170   : > { %v729_v47 = vmul.f32 %v1238_v32, %v718_v44 }
 0x171   : > { %v739_v48 = vadd.f32 %v1239_v43, %v728_v45  ;;  %v726_v49 = vmul.f32 %v1238_v32, %v715_v46  ;;  %v1065_v45 = vunpack.c.l.bf16 %v1900_v26 }
 0x172   : > { %v740_v51 = vadd.f32 %v1239_v43, %v729_v47 }
 0x173   : > { %v743_v53 = vmax.f32 %v739_v48, 0.0  ;;  %v737_v54 = vadd.f32 %v1239_v43, %v726_v49 }
 0x174   : > { %v744_v55 = vmax.f32 %v740_v51, 0.0 }
 0x175   : > { %v741_v56 = vmax.f32 %v737_v54, 0.0 }
 0x176   : > { %v746_v58 = vpack.c.bf16 %v744_v55, %v743_v53 }
 0x177   : > { %v745_v59 = vpack.c.bf16 %v742_v57, %v741_v56 }
 0x179   : > { %940 = vmatmul.mubr.bf16.vlgmr.msra.gmra.mrb[8].mxu0 %v745_v59  ;;  %1351 = vmatprep.mubr.bf16.mxu1 %v745_v59 }
 0x17a   : > { %1352 = vmatmul.mubr.bf16.vlgmr.msra.gmra.mrb[4].mxu1 %v746_v58  ;;  %949 = vmatprep.mubr.bf16.mxu0 %v1662_v0 }
 0x181   : > { %950 = vmatmul.mubr.bf16.gmra.mrb[12].mxu0 %v746_v58 }
 0x24c   : > { %v941_v60 = vpop.f32.mrb[8].mxu0 }
 0x24d   : > { %v943_v61 = vpop.f32.mrb[9].mxu0  ;;  %v1353_v62 = vpop.f32.mrb[4].mxu1  ;;  %v1009_v2 = vrot.slane %v941_v60, 7 }
 0x24e   : > { %v945_v63 = vpop.f32.mrb[10].mxu0  ;;  %v994_v1 = vpop.f32.mrb[5].mxu1  ;;  %v1023_v8 = vrot.slane %v1353_v62, 1 }
 0x24f   : > { %v1010_v3 = vrot.slane %v945_v63, 7  ;;  %v1021_v4 = vrot.slane %v994_v1, 1  ;;  %v947_v5 = vpop.f32.mrb[11].mxu0  ;;  %v1354_v7 = vpop.f32.mrb[6].mxu1 }
 0x250   : > { %v1024_v9 = vrot.slane %v1354_v7, 1  ;;  %v997_v10 = vpop.f32.mrb[7].mxu1 }
 0x251   : > { %v1015_v11 = vsel %vm669_vm0, %v1009_v2, %v1010_v3  ;;  %v1022_v12 = vrot.slane %v997_v10, 1 }
 0x252   : > { %v1034_v13 = vadd.f32 %v1015_v11, %v947_v5  ;;  %v1025_v0 = vsel %vm694_vm1, %v1023_v8, %v1024_v9  ;;  %v1028_v14 = vsel %vm694_vm1, %v1024_v9, %v1021_v4 }
 0x253   : > { %v1026_v15 = vsel %vm694_vm1, %v1022_v12, %v1023_v8  ;;  %v1027_v16 = vsel %vm694_vm1, %v1021_v4, %v1022_v12  ;;  %v1032_v24 = vsel %vm1946_vm5, %v1028_v14, 0.0 }
 0x254   : > { %v1030_v17 = vsel %vm1913_vm2, %v1026_v15, 0.0  ;;  %v951_v20 = vpop.f32.mrb[12].mxu0 }
 0x255   : > { %v1038_v21 = vadd.f32 %v1034_v13, %v1030_v17  ;;  %v1011_v22 = vrot.slane %v951_v20, 7  ;;  %v953_v23 = vpop.f32.mrb[13].mxu0 }
 0x256   : > { %v955_v27 = vpop.f32.mrb[14].mxu0 }
 0x257   : > { %v1049_v30 = vmul.f32 %v1264_v19, %v1038_v21  ;;  %v1014_v6 = vsel %vm669_vm0, %v1010_v3, %v1011_v22  ;;  %v1012_v31 = vrot.slane %v955_v27, 7  ;;  %v957_v32 = vpop.f32.mrb[15].mxu0 }
 0x258   : > { %v1019_v34 = vsel %vm1931_vm3, %v1014_v6, 0.0 }
 0x259   : > { %v1060_v35 = vadd.f32 %v1265_v25, %v1049_v30  ;;  %v1035_v36 = vadd.f32 %v1019_v34, %v953_v23  ;;  %v1016_v37 = vsel %vm669_vm0, %v1012_v31, %v1009_v2  ;;  %v1013_v38 = vsel %vm669_vm0, %v1011_v22, %v1012_v31 }
 0x25a   : > { %v1017_v39 = vsel %vm1937_vm4, %v1016_v37, 0.0  ;;  %v1036_v40 = vadd.f32 %v1013_v38, %v957_v32 }
 0x25b   : > { %v1068_v41 = vadd.f32 %v1064_v29, %v1060_v35  ;;  %v1039_v42 = vadd.f32 %v1035_v36, %v1025_v0  ;;  %v1033_v43 = vadd.f32 %v1017_v39, %v943_v61 }
 0x25c   : > { %v1040_v44 = vadd.f32 %v1036_v40, %v1032_v24 }
 0x25d   : > { %v1050_v46 = vmul.f32 %v1264_v19, %v1039_v42  ;;  %v1037_v47 = vadd.f32 %v1033_v43, %v1027_v16 }
 0x25e   : > { %v1051_v48 = vmul.f32 %v1264_v19, %v1040_v44 }
 0x25f   : > { %v1061_v49 = vadd.f32 %v1265_v25, %v1050_v46  ;;  %v1048_v50 = vmul.f32 %v1264_v19, %v1037_v47 }
 0x260   : > { %v1062_v51 = vadd.f32 %v1265_v25, %v1051_v48 }
 0x261   : > { %v1069_v53 = vadd.f32 %v1065_v45, %v1061_v49  ;;  %v1059_v54 = vadd.f32 %v1265_v25, %v1048_v50 }
 0x262   : > { %v1070_v33 = vadd.f32 %v1066_v52, %v1062_v51 }
 0x263   : > { %v1067_v55 = vadd.f32 %v1063_v28, %v1059_v54 }
 0x264   : > { %v1292_v56 = vpack.c.bf16 %v1070_v33, %v1069_v53 }
 0x265   : > { %v1287_v18 = vpack.c.bf16 %v1068_v41, %v1067_v55 }
 0x266   : > { %1294 = vst [vmem:[%s326_s14 + $0x8] sm:$0xff] %v1292_v56  }
 0x267   : > { %1288 = vst [vmem:[%s326_s14] sm:$0xff] %v1287_v18  }
 0x268   : > { %1596 = shalt.err (!%p1593_p2)
}
 0x269   : > { %s1597_s10 = scalar_lea.hbm %s2002_s9, 256  ;;  %s1601_s12 = scalar_lea.hbm %s2055_s7, 512 }
 0x26a   : > { %p1598_p13 = scmp.ne.s32.totalorder %s2002_s9, %s1597_s10  ;;  %p1602_p4 = scmp.lt.u32.totalorder %s2002_s9, %s2055_s7 }
 0x26b   : > { %p1603_p5 = scmp.lt.u32.totalorder %s1601_s12, %s1597_s10  ;;  %p1605_p11 = scmp.lt.u32.totalorder %s1597_s10, %s2002_s9 }
 0x26c   : > { %p1599_p6 = pnand %p1598_p13, %p2077_p0 }
 0x26d   : > { %p1604_p8 = por %p1603_p5, %p1602_p4 }
 0x26e   : > { %p1600_p10 = pneg %p1599_p6 }
 0x26f   : > { %p1606_p1 = por %p1605_p11, %p1604_p8 }
 0x271   : > { %p1607_p3 = pnand %p1606_p1, %p1600_p10 }
 0x273   : > { %1610 = shalt.err (!%p1607_p3)
}
 0x274   : > { %s1664_s30 = smov 64   ;;  %s1665_s20 = smov 4  }
 0x275   : > { %1365 = dma.vmem_to_hbm [thread:$0]  (%p2077_p0), %s2004_s18, 256, %s2002_s9, %s1092_s28, %s1664_s30, %s1664_s30, %s1665_s20  }
 0x276 PF: > { %s1121_s29 = sand.u32 1, %s1641_s24   ;;  %p2078_p7 = scmp.ne.s32.totalorder %s2060_s8, 0 }
 0x277   : > { %p2079_p9 = scmp.ge.s32.totalorder %s1653_s27, 2  ;;  %s1122_s11 = scalar_lea.sflag [#allocation4], %s1121_s29 }
 0x279   : > { %p1379_p12 = pnand %p2079_p9, %p2078_p7 }
 0x27b   : > { %1636 = dma.done.wait (!%p1379_p12), %s1122_s11, 256  }
 0x27c   : > { %1638 = vsyncadd (!%p1379_p12), %s1122_s11, 4294967040  ;;  %p21_p2 = scmp.ge.s32.totalorder %s1816_s13, 4   ;;  %s2080_s24 = smov %s1645_s25 }
 0x27d   : > { %s2081_s25 = smov %s1649_s26  ;;  %s2082_s26 = smov %s1832_s17 }
 0x27e   : > { %s2083_s27 = smov %s1816_s13  ;;  %23 = sbr.rel (!%p21_p2) target bundleno = 6 (0x6), region = 101 }
 0x285   :  { %1127 = vsyncpa [#allocation3], 1 }
 0x286   :  { %1129 = vsyncpa [#allocation3 + $0x1], 1 }
 0x287   :  { %1130 = vsyncpa [#allocation6], 1 }
 0x288   :  { %1131 = vsyncpa [#allocation4], 1 }
 0x289   :  { %1133 = vsyncpa [#allocation4 + $0x1], 1 }

</bundles_post_ra>
